<compile_context>
chip_gen: v7x
topology: tpu7x:2x2x1
jax: 0.10.0
libtpu: 0.0.40
codegen_flags: <defaults>
</compile_context>

<pallas_src>
import functools

import jax
import jax.numpy as jnp
from jax import lax
from jax.experimental import pallas as pl
from jax.experimental.pallas import tpu as pltpu

# Large finite negative value (instead of -inf) so masked entries can never produce NaN.
MASK_VALUE = -0.7 * float(jnp.finfo(jnp.float32).max)


# ----------------------------- RoPE table (plain JAX glue) -----------------------------
def precompute_rope_params(head_dim, theta_base=10000.0, context_length=4096):
    assert head_dim % 2 == 0, "head_dim must be even"
    inv_freq = 1.0 / theta_base ** (
        jnp.arange(0, head_dim, 2)[: head_dim // 2].astype(jnp.float32) / head_dim
    )
    positions = jnp.arange(context_length, dtype=jnp.float32)
    angles = positions[:, None] * inv_freq[None, :]
    angles = jnp.concatenate([angles, angles], axis=1)  # (context_length, head_dim)
    return jnp.cos(angles), jnp.sin(angles)


def _rotate_half(t, half):
    # Llama rotate-half returns [-t2, t1]; the "-" sign is folded into the sin table, so this is
    # just a swap of the two halves (shift == dim/2, rotation direction irrelevant).
    if (2 * half) % 128 == 0:
        return pltpu.roll(t, shift=half, axis=1)  # XLU lane rotate, no lane-axis concat
    # Fallback for small / unaligned head_dim.
    return jnp.concatenate([t[:, half:], t[:, :half]], axis=1)


def _fold_index(i, n):
    # Bijection on [0, n): 0, n-1, 1, n-2, ...  Interleaves light/heavy causal q tiles so any
    # contiguous split of the q-tile grid axis across TensorCores is load-balanced.
    h = i // 2
    r = i % 2
    return h + r * (n - 1 - 2 * h)


# ----------------------------- kernel 1: fused Q/K/V projection + RoPE -----------------------------
def _qkv_rope_kernel(x_ref, wq_ref, wkv_ref, cos_ref, sin_ref, q_out, k_out, v_out,
                     *, num_heads, head_dim):
    d_out = num_heads * head_dim
    half = head_dim // 2

    x_b = x_ref[0]                                                           # (TS, d_in) bf16
    q2d = jnp.dot(x_b, wq_ref[...], preferred_element_type=jnp.float32)     # (TS, d_out) f32
    kv2d = jnp.dot(x_b, wkv_ref[...], preferred_element_type=jnp.float32)   # (TS, 2*d_out) f32
    cos = cos_ref[...]                                                       # (TS, hd) f32
    sin = sin_ref[...]                                                       # sign-folded sin

    for h in range(num_heads):
        lo = h * head_dim
        qh = q2d[:, lo:lo + head_dim]
        q_out[0, h] = (qh * cos + _rotate_half(qh, half) * sin).astype(q_out.dtype)
        kh = kv2d[:, lo:lo + head_dim]
        k_out[0, h] = (kh * cos + _rotate_half(kh, half) * sin).astype(k_out.dtype)
        v_out[0, h] = kv2d[:, d_out + lo:d_out + lo + head_dim].astype(v_out.dtype)


# ----------------------------- kernel 2: flash attention (per batch, head, q-tile) -----------------------------
def _online_softmax_update(q, kh, vh, m_scr, l_scr, acc_scr, mask=None):
    # scores: contract last dims directly (no materialized transpose)
    s = lax.dot_general(q, kh, (((1,), (1,)), ((), ())),
                        preferred_element_type=jnp.float32)                  # (TQ, TK) f32
    if mask is not None:
        s = jnp.where(mask, MASK_VALUE, s)
    m_prev = m_scr[...]                                                      # (TQ, 1)
    m_new = jnp.maximum(m_prev, jnp.max(s, axis=-1, keepdims=True))
    alpha = jnp.exp(m_prev - m_new)
    p = jnp.exp(s - m_new)
    l_scr[...] = alpha * l_scr[...] + jnp.sum(p, axis=-1, keepdims=True)
    acc_scr[...] = alpha * acc_scr[...] + jnp.dot(
        p.astype(vh.dtype), vh, preferred_element_type=jnp.float32)
    m_scr[...] = m_new


def _flash_attn_kernel(q_ref, k_ref, v_ref, o_ref, acc_scr, m_scr, l_scr,
                       *, block_q, block_k, num_q_tiles):
    qi = _fold_index(pl.program_id(2), num_q_tiles)      # physical q-tile index (folded grid axis)

    # scratch persists across grid steps -> re-init every step
    m_scr[...] = jnp.full(m_scr.shape, MASK_VALUE, dtype=m_scr.dtype)
    l_scr[...] = jnp.zeros_like(l_scr)
    acc_scr[...] = jnp.zeros_like(acc_scr)

    q = q_ref[0, 0]                                                          # (TQ, hd) bf16, RoPE'd + scaled

    # --- sub-diagonal KV tiles (fully visible): no mask work at all ---
    @pl.loop(0, qi)
    def _kv_step(j):
        k_start = pl.multiple_of(j * block_k, block_k)
        kh = k_ref[0, 0, pl.ds(k_start, block_k), :]                         # (TK, hd) bf16
        vh = v_ref[0, 0, pl.ds(k_start, block_k), :]
        _online_softmax_update(q, kh, vh, m_scr, l_scr, acc_scr)

    # --- diagonal KV tile (always exists; block_q == block_k so it aligns exactly) ---
    d_start = pl.multiple_of(qi * block_k, block_k)
    kh = k_ref[0, 0, pl.ds(d_start, block_k), :]
    vh = v_ref[0, 0, pl.ds(d_start, block_k), :]
    row = lax.broadcasted_iota(jnp.int32, (block_q, block_k), 0)
    col = lax.broadcasted_iota(jnp.int32, (block_q, block_k), 1)
    _online_softmax_update(q, kh, vh, m_scr, l_scr, acc_scr, mask=col > row)

    # --- finalize: normalize and store (lane-dense (TQ, hd) bf16 block) ---
    o_ref[0, 0] = (acc_scr[...] * pl.reciprocal(l_scr[...], approx=True)).astype(o_ref.dtype)


# ----------------------------- kernel 3: output projection -----------------------------
def _out_proj_kernel(ctx_ref, wo_ref, o_ref, *, num_heads, head_dim):
    acc = None
    for h in range(num_heads):
        lo = h * head_dim
        part = jnp.dot(ctx_ref[0, h], wo_ref[lo:lo + head_dim, :],
                       preferred_element_type=jnp.float32)                   # (TQ, d_out) f32
        acc = part if acc is None else acc + part
    o_ref[0] = acc.astype(o_ref.dtype)


# ----------------------------- wrapper -----------------------------
def multi_head_attention(x, Wq, Wk, Wv, Wo, cos, sin, num_heads, *, block_q=128):
    # block_q=128 is MXU-optimal on v5e; prefer 256 on v6e/v7x (2x256^2 MXU) when VMEM allows.
    b, T, d_in = x.shape
    d_out = Wq.shape[0]
    assert d_out % num_heads == 0
    head_dim = d_out // num_heads
    assert head_dim % 2 == 0
    half = head_dim // 2

    block_q = min(block_q, T)
    assert T % block_q == 0 and block_q % 8 == 0, "T must be a multiple of block_q (mult of 8)"
    block_k = block_q
    nq = T // block_q

    scale = 1.0 / (float(head_dim) ** 0.5)

    # bf16 activations / weights; f32 accumulation happens inside the kernels.
    x_bf = x.astype(jnp.bfloat16)
    wq_t = (Wq.T * scale).astype(jnp.bfloat16)                               # (d_in, d_out), scale folded
    wkv_t = jnp.concatenate([Wk.T, Wv.T], axis=1).astype(jnp.bfloat16)       # (d_in, 2*d_out)
    wo_t = Wo.T.astype(jnp.bfloat16)                                         # (d_out, d_out)

    # RoPE tables; the "-t2" sign of rotate-half is folded into the sin table.
    sign = jnp.concatenate([-jnp.ones((half,), jnp.float32),
                            jnp.ones((half,), jnp.float32)])
    cos_t = cos[:T].astype(jnp.float32)                                      # (T, head_dim)
    sin_t = sin[:T].astype(jnp.float32) * sign[None, :]

    # ---------------- pass 1: Q/K/V projection + RoPE (computed once) ----------------
    qkv_kernel = functools.partial(_qkv_rope_kernel, num_heads=num_heads, head_dim=head_dim)
    qkv_shape = jax.ShapeDtypeStruct((b, num_heads, T, head_dim), jnp.bfloat16)
    q, k, v = pl.pallas_call(
        qkv_kernel,
        out_shape=[qkv_shape, qkv_shape, qkv_shape],
        grid_spec=pltpu.PrefetchScalarGridSpec(
            num_scalar_prefetch=0,
            grid=(b, nq),
            in_specs=[
                pl.BlockSpec((1, block_q, d_in), lambda bi, si: (bi, si, 0)),           # x tile
                pl.BlockSpec((d_in, d_out), lambda bi, si: (0, 0),
                             pipeline_mode=pl.Buffered(1)),                             # Wq^T * scale
                pl.BlockSpec((d_in, 2 * d_out), lambda bi, si: (0, 0),
                             pipeline_mode=pl.Buffered(1)),                             # [Wk^T | Wv^T]
                pl.BlockSpec((block_q, head_dim), lambda bi, si: (si, 0)),               # cos
                pl.BlockSpec((block_q, head_dim), lambda bi, si: (si, 0)),               # sin (sign folded)
            ],
            out_specs=[
                pl.BlockSpec((1, num_heads, block_q, head_dim), lambda bi, si: (bi, 0, si, 0)),
                pl.BlockSpec((1, num_heads, block_q, head_dim), lambda bi, si: (bi, 0, si, 0)),
                pl.BlockSpec((1, num_heads, block_q, head_dim), lambda bi, si: (bi, 0, si, 0)),
            ],
        ),
        compiler_params=pltpu.CompilerParams(dimension_semantics=("parallel", "parallel")),
    )(x_bf, wq_t, wkv_t, cos_t, sin_t)

    # ---------------- pass 2: flash attention (causal, online softmax) ----------------
    attn_kernel = functools.partial(_flash_attn_kernel, block_q=block_q, block_k=block_k,
                                    num_q_tiles=nq)
    ctx = pl.pallas_call(
        attn_kernel,
        out_shape=jax.ShapeDtypeStruct((b, num_heads, T, head_dim), jnp.bfloat16),
        grid_spec=pltpu.PrefetchScalarGridSpec(
            num_scalar_prefetch=0,
            grid=(b, num_heads, nq),
            in_specs=[
                # Q tile for this (folded) q-tile index
                pl.BlockSpec((1, 1, block_q, head_dim),
                             lambda bi, h, g: (bi, h, _fold_index(g, nq), 0)),
                # whole K / V row for this (b, h): index map independent of g -> DMA'd once per (b,h)
                pl.BlockSpec((1, 1, T, head_dim), lambda bi, h, g: (bi, h, 0, 0)),
                pl.BlockSpec((1, 1, T, head_dim), lambda bi, h, g: (bi, h, 0, 0)),
            ],
            out_specs=pl.BlockSpec((1, 1, block_q, head_dim),
                                   lambda bi, h, g: (bi, h, _fold_index(g, nq), 0)),
            scratch_shapes=[
                pltpu.VMEM((block_q, head_dim), jnp.float32),                # acc
                pltpu.VMEM((block_q, 1), jnp.float32),                       # m (running max)
                pltpu.VMEM((block_q, 1), jnp.float32),                       # l (running denom)
            ],
        ),
        compiler_params=pltpu.CompilerParams(
            dimension_semantics=("parallel", "parallel", "parallel")),
    )(q, k, v)

    # ---------------- pass 3: output projection ----------------
    op_kernel = functools.partial(_out_proj_kernel, num_heads=num_heads, head_dim=head_dim)
    out = pl.pallas_call(
        op_kernel,
        out_shape=jax.ShapeDtypeStruct((b, T, d_out), x.dtype),
        grid_spec=pltpu.PrefetchScalarGridSpec(
            num_scalar_prefetch=0,
            grid=(b, nq),
            in_specs=[
                pl.BlockSpec((1, num_heads, block_q, head_dim), lambda bi, si: (bi, 0, si, 0)),
                pl.BlockSpec((d_out, d_out), lambda bi, si: (0, 0),
                             pipeline_mode=pl.Buffered(1)),                  # Wo^T
            ],
            out_specs=pl.BlockSpec((1, block_q, d_out), lambda bi, si: (bi, si, 0)),
        ),
        compiler_params=pltpu.CompilerParams(dimension_semantics=("parallel", "parallel")),
    )(ctx, wo_t)

    return out


# ----------------------------- pure-JAX reference (for verification) -----------------------------
def mha_reference(x, Wq, Wk, Wv, Wo, cos, sin, num_heads):
    b, T, d_in = x.shape
    d_out = Wq.shape[0]
    hd = d_out // num_heads

    def split(t):
        return t.reshape(b, T, num_heads, hd).transpose(0, 2, 1, 3)  # (b, H, T, hd)

    q = split(x @ Wq.T)
    k = split(x @ Wk.T)
    v = split(x @ Wv.T)

    cos_t = cos[:T][None, None]
    sin_t = sin[:T][None, None]

    def rope(t):
        t1 = t[..., : hd // 2]
        t2 = t[..., hd // 2:]
        rotated = jnp.concatenate([-t2, t1], axis=-1)
        return t * cos_t + rotated * sin_t

    q = rope(q)
    k = rope(k)
    s = jnp.einsum("bhtd,bhsd->bhts", q, k)
    mask = jnp.triu(jnp.ones((T, T), dtype=bool), k=1)
    s = jnp.where(mask[None, None], -jnp.inf, s) / (float(hd) ** 0.5)
    w = jax.nn.softmax(s, axis=-1)
    ctx = jnp.einsum("bhts,bhsd->bhtd", w, v).transpose(0, 2, 1, 3).reshape(b, T, d_out)
    return ctx @ Wo.T


if __name__ == "__main__":
    # Small but TPU-tiling-friendly shapes: batch=2, seq=384 (3 q-tiles of 128, exercises the
    # causal loop and the folded q-tile ordering), d_in=128, d_out=256, 2 heads of head_dim=128.
    B, T, D_IN, D_OUT, NUM_HEADS = 2, 384, 128, 256, 2
    CONTEXT_LEN = 512
    HEAD_DIM = D_OUT // NUM_HEADS

    key = jax.random.PRNGKey(0)
    kx, kq, kk, kv, ko = jax.random.split(key, 5)
    x = jax.random.normal(kx, (B, T, D_IN), dtype=jnp.float32)
    Wq = jax.random.normal(kq, (D_OUT, D_IN), dtype=jnp.float32) * 0.05
    Wk = jax.random.normal(kk, (D_OUT, D_IN), dtype=jnp.float32) * 0.05
    Wv = jax.random.normal(kv, (D_OUT, D_IN), dtype=jnp.float32) * 0.05
    Wo = jax.random.normal(ko, (D_OUT, D_OUT), dtype=jnp.float32) * 0.05

    cos, sin = precompute_rope_params(HEAD_DIM, context_length=CONTEXT_LEN)

    out = multi_head_attention(x, Wq, Wk, Wv, Wo, cos, sin, NUM_HEADS, block_q=128)
    out = jax.block_until_ready(out)

    ref = jax.block_until_ready(mha_reference(x, Wq, Wk, Wv, Wo, cos, sin, NUM_HEADS))
    assert out.shape == (B, T, D_OUT)
    max_err = float(jnp.max(jnp.abs(out - ref)))
    # Kernel computes in bf16 with f32 accumulation (+ approx reciprocal); reference is full f32.
    assert jnp.allclose(out, ref, rtol=2e-2, atol=2e-2), f"mismatch vs reference, max_abs_err={max_err}"
    print("KERNEL_OK")
</pallas_src>

<mosaic_0001>
module attributes {stable_mosaic.version = 11 : i64} {
  func.func @_qkv_rope_kernel(%arg0: i32, %arg1: i32, %arg2: memref<1x128x128xbf16, #tpu.memory_space<vmem>>, %arg3: memref<128x256xbf16, #tpu.memory_space<vmem>>, %arg4: memref<128x512xbf16, #tpu.memory_space<vmem>>, %arg5: memref<128x128xf32, #tpu.memory_space<vmem>>, %arg6: memref<128x128xf32, #tpu.memory_space<vmem>>, %arg7: memref<1x2x128x128xbf16, #tpu.memory_space<vmem>>, %arg8: memref<1x2x128x128xbf16, #tpu.memory_space<vmem>>, %arg9: memref<1x2x128x128xbf16, #tpu.memory_space<vmem>>) attributes {dimension_semantics = [#tpu.dimension_semantics<parallel>, #tpu.dimension_semantics<parallel>], iteration_bounds = array<i64: 2, 3>, scalar_prefetch = 0 : i64, scratch_operands = 0 : i64, tpu.core_type = #tpu.core_type<tc>, window_params = [{transform_indices = @transform_0, window_bounds = array<i64: 1, 128, 128>}, {pipeline_mode = #tpu.pipeline_mode<synchronous>, transform_indices = @transform_1, window_bounds = array<i64: 128, 256>}, {pipeline_mode = #tpu.pipeline_mode<synchronous>, transform_indices = @transform_2, window_bounds = array<i64: 128, 512>}, {transform_indices = @transform_3, window_bounds = array<i64: 128, 128>}, {transform_indices = @transform_4, window_bounds = array<i64: 128, 128>}, {transform_indices = @transform_5, window_bounds = array<i64: 1, 2, 128, 128>}, {transform_indices = @transform_6, window_bounds = array<i64: 1, 2, 128, 128>}, {transform_indices = @transform_7, window_bounds = array<i64: 1, 2, 128, 128>}]} {
    %c0 = arith.constant 0 : index
    %c0_0 = arith.constant 0 : index
    %c0_1 = arith.constant 0 : index
    %0 = vector.load %arg2[%c0, %c0_0, %c0_1] : memref<1x128x128xbf16, #tpu.memory_space<vmem>>, vector<1x128x128xbf16>
    %1 = vector.shape_cast %0 : vector<1x128x128xbf16> to vector<128x128xbf16>
    %c0_2 = arith.constant 0 : index
    %c0_3 = arith.constant 0 : index
    %2 = vector.load %arg3[%c0_2, %c0_3] : memref<128x256xbf16, #tpu.memory_space<vmem>>, vector<128x256xbf16>
    %cst = arith.constant dense<0.000000e+00> : vector<128x256xf32>
    %3 = tpu.matmul %1, %2, %cst {dimension_numbers = #tpu.dot_dimension_numbers<[1], [0], [0], [1], [0, 0, 1, 1], [], []>} : vector<128x128xbf16>, vector<128x256xbf16>, vector<128x256xf32> -> vector<128x256xf32>
    %c0_4 = arith.constant 0 : index
    %c0_5 = arith.constant 0 : index
    %4 = vector.load %arg4[%c0_4, %c0_5] : memref<128x512xbf16, #tpu.memory_space<vmem>>, vector<128x512xbf16>
    %cst_6 = arith.constant dense<0.000000e+00> : vector<128x512xf32>
    %5 = tpu.matmul %1, %4, %cst_6 {dimension_numbers = #tpu.dot_dimension_numbers<[1], [0], [0], [1], [0, 0, 1, 1], [], []>} : vector<128x128xbf16>, vector<128x512xbf16>, vector<128x512xf32> -> vector<128x512xf32>
    %c0_7 = arith.constant 0 : index
    %c0_8 = arith.constant 0 : index
    %6 = vector.load %arg5[%c0_7, %c0_8] : memref<128x128xf32, #tpu.memory_space<vmem>>, vector<128x128xf32>
    %c0_9 = arith.constant 0 : index
    %c0_10 = arith.constant 0 : index
    %7 = vector.load %arg6[%c0_9, %c0_10] : memref<128x128xf32, #tpu.memory_space<vmem>>, vector<128x128xf32>
    %8 = vector.extract_strided_slice %3 {offsets = [0, 0], sizes = [128, 128], strides = [1, 1]} : vector<128x256xf32> to vector<128x128xf32>
    %9 = arith.mulf %8, %6 : vector<128x128xf32>
    %c64_i32 = arith.constant 64 : i32
    %10 = tpu.dynamic_rotate %8 by %c64_i32 dim 1 : vector<128x128xf32>, i32 -> vector<128x128xf32>
    %11 = arith.mulf %10, %7 : vector<128x128xf32>
    %12 = arith.addf %9, %11 : vector<128x128xf32>
    %13 = arith.truncf %12 : vector<128x128xf32> to vector<128x128xbf16>
    %c0_11 = arith.constant 0 : index
    %c0_12 = arith.constant 0 : index
    %c0_13 = arith.constant 0 : index
    %c0_14 = arith.constant 0 : index
    %14 = vector.load %arg7[%c0_11, %c0_12, %c0_13, %c0_14] : memref<1x2x128x128xbf16, #tpu.memory_space<vmem>>, vector<1x1x128x128xbf16>
    %15 = vector.shape_cast %14 : vector<1x1x128x128xbf16> to vector<128x128xbf16>
    %16 = vector.shape_cast %13 : vector<128x128xbf16> to vector<1x1x128x128xbf16>
    tpu.vector_store %arg7[%c0_11, %c0_12, %c0_13, %c0_14], %16 {strides = array<i32>} : memref<1x2x128x128xbf16, #tpu.memory_space<vmem>>, vector<1x1x128x128xbf16>,
    %17 = vector.extract_strided_slice %5 {offsets = [0, 0], sizes = [128, 128], strides = [1, 1]} : vector<128x512xf32> to vector<128x128xf32>
    %18 = arith.mulf %17, %6 : vector<128x128xf32>
    %c64_i32_15 = arith.constant 64 : i32
    %19 = tpu.dynamic_rotate %17 by %c64_i32_15 dim 1 : vector<128x128xf32>, i32 -> vector<128x128xf32>
    %20 = arith.mulf %19, %7 : vector<128x128xf32>
    %21 = arith.addf %18, %20 : vector<128x128xf32>
    %22 = arith.truncf %21 : vector<128x128xf32> to vector<128x128xbf16>
    %c0_16 = arith.constant 0 : index
    %c0_17 = arith.constant 0 : index
    %c0_18 = arith.constant 0 : index
    %c0_19 = arith.constant 0 : index
    %23 = vector.load %arg8[%c0_16, %c0_17, %c0_18, %c0_19] : memref<1x2x128x128xbf16, #tpu.memory_space<vmem>>, vector<1x1x128x128xbf16>
    %24 = vector.shape_cast %23 : vector<1x1x128x128xbf16> to vector<128x128xbf16>
    %25 = vector.shape_cast %22 : vector<128x128xbf16> to vector<1x1x128x128xbf16>
    tpu.vector_store %arg8[%c0_16, %c0_17, %c0_18, %c0_19], %25 {strides = array<i32>} : memref<1x2x128x128xbf16, #tpu.memory_space<vmem>>, vector<1x1x128x128xbf16>,
    %26 = vector.extract_strided_slice %5 {offsets = [0, 256], sizes = [128, 128], strides = [1, 1]} : vector<128x512xf32> to vector<128x128xf32>
    %27 = arith.truncf %26 : vector<128x128xf32> to vector<128x128xbf16>
    %c0_20 = arith.constant 0 : index
    %c0_21 = arith.constant 0 : index
    %c0_22 = arith.constant 0 : index
    %c0_23 = arith.constant 0 : index
    %28 = vector.load %arg9[%c0_20, %c0_21, %c0_22, %c0_23] : memref<1x2x128x128xbf16, #tpu.memory_space<vmem>>, vector<1x1x128x128xbf16>
    %29 = vector.shape_cast %28 : vector<1x1x128x128xbf16> to vector<128x128xbf16>
    %30 = vector.shape_cast %27 : vector<128x128xbf16> to vector<1x1x128x128xbf16>
    tpu.vector_store %arg9[%c0_20, %c0_21, %c0_22, %c0_23], %30 {strides = array<i32>} : memref<1x2x128x128xbf16, #tpu.memory_space<vmem>>, vector<1x1x128x128xbf16>,
    %31 = vector.extract_strided_slice %3 {offsets = [0, 128], sizes = [128, 128], strides = [1, 1]} : vector<128x256xf32> to vector<128x128xf32>
    %32 = arith.mulf %31, %6 : vector<128x128xf32>
    %c64_i32_24 = arith.constant 64 : i32
    %33 = tpu.dynamic_rotate %31 by %c64_i32_24 dim 1 : vector<128x128xf32>, i32 -> vector<128x128xf32>
    %34 = arith.mulf %33, %7 : vector<128x128xf32>
    %35 = arith.addf %32, %34 : vector<128x128xf32>
    %36 = arith.truncf %35 : vector<128x128xf32> to vector<128x128xbf16>
    %c0_25 = arith.constant 0 : index
    %c1 = arith.constant 1 : index
    %c0_26 = arith.constant 0 : index
    %c0_27 = arith.constant 0 : index
    %37 = vector.load %arg7[%c0_25, %c1, %c0_26, %c0_27] : memref<1x2x128x128xbf16, #tpu.memory_space<vmem>>, vector<1x1x128x128xbf16>
    %38 = vector.shape_cast %37 : vector<1x1x128x128xbf16> to vector<128x128xbf16>
    %39 = vector.shape_cast %36 : vector<128x128xbf16> to vector<1x1x128x128xbf16>
    tpu.vector_store %arg7[%c0_25, %c1, %c0_26, %c0_27], %39 {strides = array<i32>} : memref<1x2x128x128xbf16, #tpu.memory_space<vmem>>, vector<1x1x128x128xbf16>,
    %40 = vector.extract_strided_slice %5 {offsets = [0, 128], sizes = [128, 128], strides = [1, 1]} : vector<128x512xf32> to vector<128x128xf32>
    %41 = arith.mulf %40, %6 : vector<128x128xf32>
    %c64_i32_28 = arith.constant 64 : i32
    %42 = tpu.dynamic_rotate %40 by %c64_i32_28 dim 1 : vector<128x128xf32>, i32 -> vector<128x128xf32>
    %43 = arith.mulf %42, %7 : vector<128x128xf32>
    %44 = arith.addf %41, %43 : vector<128x128xf32>
    %45 = arith.truncf %44 : vector<128x128xf32> to vector<128x128xbf16>
    %c0_29 = arith.constant 0 : index
    %c1_30 = arith.constant 1 : index
    %c0_31 = arith.constant 0 : index
    %c0_32 = arith.constant 0 : index
    %46 = vector.load %arg8[%c0_29, %c1_30, %c0_31, %c0_32] : memref<1x2x128x128xbf16, #tpu.memory_space<vmem>>, vector<1x1x128x128xbf16>
    %47 = vector.shape_cast %46 : vector<1x1x128x128xbf16> to vector<128x128xbf16>
    %48 = vector.shape_cast %45 : vector<128x128xbf16> to vector<1x1x128x128xbf16>
    tpu.vector_store %arg8[%c0_29, %c1_30, %c0_31, %c0_32], %48 {strides = array<i32>} : memref<1x2x128x128xbf16, #tpu.memory_space<vmem>>, vector<1x1x128x128xbf16>,
    %49 = vector.extract_strided_slice %5 {offsets = [0, 384], sizes = [128, 128], strides = [1, 1]} : vector<128x512xf32> to vector<128x128xf32>
    %50 = arith.truncf %49 : vector<128x128xf32> to vector<128x128xbf16>
    %c0_33 = arith.constant 0 : index
    %c1_34 = arith.constant 1 : index
    %c0_35 = arith.constant 0 : index
    %c0_36 = arith.constant 0 : index
    %51 = vector.load %arg9[%c0_33, %c1_34, %c0_35, %c0_36] : memref<1x2x128x128xbf16, #tpu.memory_space<vmem>>, vector<1x1x128x128xbf16>
    %52 = vector.shape_cast %51 : vector<1x1x128x128xbf16> to vector<128x128xbf16>
    %53 = vector.shape_cast %50 : vector<128x128xbf16> to vector<1x1x128x128xbf16>
    tpu.vector_store %arg9[%c0_33, %c1_34, %c0_35, %c0_36], %53 {strides = array<i32>} : memref<1x2x128x128xbf16, #tpu.memory_space<vmem>>, vector<1x1x128x128xbf16>,
    return
  }
  func.func @transform_0(%arg0: i32, %arg1: i32) -> (i32, i32, i32) {
    %c0_i32 = arith.constant 0 : i32
    %c0_i32_0 = arith.constant 0 : i32
    return %arg0, %arg1, %c0_i32 : i32, i32, i32
  }
  func.func @transform_1(%arg0: i32, %arg1: i32) -> (i32, i32) {
    %c0_i32 = arith.constant 0 : i32
    %c0_i32_0 = arith.constant 0 : i32
    %c0_i32_1 = arith.constant 0 : i32
    return %c0_i32, %c0_i32_0 : i32, i32
  }
  func.func @transform_2(%arg0: i32, %arg1: i32) -> (i32, i32) {
    %c0_i32 = arith.constant 0 : i32
    %c0_i32_0 = arith.constant 0 : i32
    %c0_i32_1 = arith.constant 0 : i32
    return %c0_i32, %c0_i32_0 : i32, i32
  }
  func.func @transform_3(%arg0: i32, %arg1: i32) -> (i32, i32) {
    %c0_i32 = arith.constant 0 : i32
    %c0_i32_0 = arith.constant 0 : i32
    return %arg1, %c0_i32 : i32, i32
  }
  func.func @transform_4(%arg0: i32, %arg1: i32) -> (i32, i32) {
    %c0_i32 = arith.constant 0 : i32
    %c0_i32_0 = arith.constant 0 : i32
    return %arg1, %c0_i32 : i32, i32
  }
  func.func @transform_5(%arg0: i32, %arg1: i32) -> (i32, i32, i32, i32) {
    %c0_i32 = arith.constant 0 : i32
    %c0_i32_0 = arith.constant 0 : i32
    %c0_i32_1 = arith.constant 0 : i32
    return %arg0, %c0_i32, %arg1, %c0_i32_0 : i32, i32, i32, i32
  }
  func.func @transform_6(%arg0: i32, %arg1: i32) -> (i32, i32, i32, i32) {
    %c0_i32 = arith.constant 0 : i32
    %c0_i32_0 = arith.constant 0 : i32
    %c0_i32_1 = arith.constant 0 : i32
    return %arg0, %c0_i32, %arg1, %c0_i32_0 : i32, i32, i32, i32
  }
  func.func @transform_7(%arg0: i32, %arg1: i32) -> (i32, i32, i32, i32) {
    %c0_i32 = arith.constant 0 : i32
    %c0_i32_0 = arith.constant 0 : i32
    %c0_i32_1 = arith.constant 0 : i32
    return %arg0, %c0_i32, %arg1, %c0_i32_0 : i32, i32, i32, i32
  }
}

</mosaic_0001>

<bundles_post_ra>
// kernel: tpu_custom_call.1
= control target key start
LH: loop header
LB: loop body
LE: loop exit
PB: predicated region body
PF: predicated region fallthrough
CT: control target
= control target key end

     0   :  { %s4706_s0 = inlined_call_operand.hbm [shape: bf16[2,384,128], index: 0, kind: input, shape index: {}]   ;;  %s4707_s1 = inlined_call_operand.hbm [shape: bf16[128,256], index: 1, kind: input, shape index: {}]   ;;  %s4708_s2 = inlined_call_operand.hbm [shape: bf16[128,512], index: 2, kind: input, shape index: {}]   ;;  %s4709_s3 = inlined_call_operand.hbm [shape: f32[384,128], index: 3, kind: input, shape index: {}]   ;;  %s4710_s4 = inlined_call_operand.hbm [shape: f32[384,128], index: 4, kind: input, shape index: {}]   ;;  %s4711_s5 = inlined_call_operand.hbm [shape: bf16[2,2,384,128], index: 5, kind: output, shape index: {0}]   ;;  %s4712_s6 = inlined_call_operand.hbm [shape: bf16[2,2,384,128], index: 6, kind: output, shape index: {1}]   ;;  %s4713_s7 = inlined_call_operand.hbm [shape: bf16[2,2,384,128], index: 7, kind: output, shape index: {2}]  }
   0x1   :  { %4768 = sst [smem:[#allocation63_spill]] %s4707_s1 }
   0x2   :  { %4769 = sst [smem:[#allocation64_spill]] %s4708_s2 }
   0x3   :  { %4770 = sst [smem:[#allocation65_spill]] %s4709_s3 }
   0x4   :  { %4771 = sst [smem:[#allocation66_spill]] %s4711_s5 }
   0x5   :  { %4772 = sst [smem:[#allocation67_spill]] %s4712_s6 }
   0x6   :  { %4773 = sst [smem:[#allocation68_spill]] %s4713_s7 }
   0x7   :  { %13 = vsyncpa [#allocation3], 0 }
   0x8   :  { %15 = vsyncpa [#allocation3 + $0x1], 0 }
   0x9   :  { %16 = vsyncpa [#allocation6], 0 }
   0xa   :  { %17 = vsyncpa [#allocation9], 0 }
   0xb   :  { %19 = vsyncpa [#allocation9 + $0x1], 0 }
   0xc   :  { %20 = vsyncpa [#allocation4], 0 }
   0xd   :  { %22 = vsyncpa [#allocation4 + $0x1], 0 }
   0xe   :  { %23 = vsyncpa [#allocation13], 0 }
   0xf   :  { %25 = vsyncpa [#allocation13 + $0x1], 0  ;;  %s3580_s24 = smov 0   ;;  %s3582_s25 = smov 0  }
  0x10   :  { %s3584_s26 = smov 0   ;;  %s3586_s27 = smov 0  }
  0x11   :  { %s3588_s28 = smov 0   ;;  %s3590_s29 = smov 0  }
  0x12   :  { %s3592_s30 = smov 0   ;;  %s3594_s8 = smov 0  }
  0x13   :  { %s3596_s9 = smov 0   ;;  %s3598_s10 = smov 0  }
  0x14   :  { %s3600_s11 = smov 0  }
  0x15 LB: > { %4774 = sst [smem:[#allocation26_spill]] %s3468_s25  ;;  %s3634_s12 = sadd.s32 4294967295, %s3504_s11   ;;  %s3504_s11 = sphi %s3600_s11, %s31_s11   ;;  %s3500_s10 = sphi %s3598_s10, %s4888_s10   ;;  %s3496_s9 = sphi %s3596_s9, %s4883_s9   ;;  %s3492_s8 = sphi %s3594_s8, %s4887_s8   ;;  %s3488_s30 = sphi %s3592_s30, %s4882_s30   ;;  %s3484_s29 = sphi %s3590_s29, %s4886_s29   ;;  %s3480_s28 = sphi %s3588_s28, %s4885_s28   ;;  %s3476_s27 = sphi %s3586_s27, %s4884_s27   ;;  %s3472_s26 = sphi %s3584_s26, %s4881_s26   ;;  %s3468_s25 = sphi %s3582_s25, %s4880_s25   ;;  %s3464_s24 = sphi %s3580_s24, %s4879_s24  }
  0x16   : > { %4775 = sst [smem:[#allocation27_spill]] %s3472_s26  ;;  %s4714_s13 = sadd.s32 4294967294, %s3504_s11  }
  0x17   : > { %4776 = sst [smem:[#allocation28_spill]] %s3476_s27  ;;  %p65_p0 = scmp.ne.s32.totalorder %s3480_s28, %s3476_s27 }
  0x18   : > { %4777 = sst [smem:[#allocation29_spill]] %s3488_s30  ;;  %p4717_p1 = scmp.eq.s32.totalorder %s3634_s12, 0 }
  0x19   : > { %4778 = sst [smem:[#allocation30_spill]] %s3492_s8  ;;  %p133_p2 = scmp.ne.s32.totalorder %s3468_s25, %s3464_s24 }
  0x1a   : > { %4779 = sst [smem:[#allocation31_spill]] %s3496_s9  ;;  %p3644_p4 = por %p4717_p1, %p65_p0 }
  0x1b   : > { %p191_p5 = scmp.eq.s32.totalorder %s4714_s13, 5  ;;  %p3652_p6 = por %p133_p2, %p4717_p1 }
  0x1c   : > { %s4780_s14 = scalar_select %p3644_p4, 1, 0 }
  0x1d   : > { %s4782_s15 = scalar_select %p3652_p6, 1, 0 }
  0x1e   : > { %4781 = sst [smem:[#allocation32_spill]] %s4780_s14  ;;  %p2346_p7 = scmp.ge.s32.totalorder %s3504_s11, 1 }
  0x1f   : > { %4783 = sst [smem:[#allocation33_spill]] %s4782_s15  ;;  %p3657_p8 = por %p191_p5, %p65_p0 }
  0x20   : > { %p254_p9 = scmp.lt.s32.totalorder %s3504_s11, 7  ;;  %s3506_s18 = smov [#allocation5]  }
  0x21   : > { %s4784_s16 = scalar_select %p3657_p8, 1, 0 }
  0x22   : > { %p3662_p10 = pnand %p2346_p7, %p254_p9  ;;  %s266_s19 = sshll.u32 %s3506_s18, 4  ;;  %s267_s19 = int_to_ptr.vmem [resolvable:$true] %s266_s19 }
  0x23   : > { %4785 = sst [smem:[#allocation34_spill]] %s4784_s16  ;;  %s40_s21 = sadd.s32 1, %s3496_s9 }
  0x24   : > { %s4786_s17 = scalar_select %p3662_p10, 1, 0 }
  0x25   : > { %p3020_p11 = pneg %p3662_p10  ;;  %s4789_s1 = sld [smem:[#allocation63_spill]] }
  0x26   : > { %4787 = sst [smem:[#allocation35_spill]] %s4786_s17 }
  0x27   : > { %p3670_p12 = pnand %p3020_p11, %p4717_p1 }
  0x29   : > { %p4730_p0 = pneg %p3670_p12 }
  0x2b   : > { %s3252_s24 = scalar_lea.hbm %s4789_s1, 2048 }
  0x2c   : > { %p3253_p13 = scmp.ne.s32.totalorder %s4789_s1, %s3252_s24  ;;  %p3259_p7 = scmp.lt.u32.totalorder %s3252_s24, %s4789_s1 }
  0x2e   : > { %p3255_p2 = pnand %p4730_p0, %p3253_p13 }
  0x30   : > { %p3256_p5 = pneg %p3255_p2 }
  0x32   : > { %p3261_p9 = pnand %p3259_p7, %p3256_p5 }
  0x34   : > { %3264 = shalt.err (!%p3261_p9)
}
  0x35   : > { %s3265_s7 = scalar_lea.vmem %s267_s19, 2048  ;;  %p3273_p8 = scmp.lt.s32.totalorder %s267_s19, %s267_s19 }
  0x36   : > { %p3266_p11 = scmp.ne.s32.totalorder %s267_s19, %s3265_s7  ;;  %p3274_p6 = scmp.lt.s32.totalorder %s3265_s7, %s3265_s7 }
  0x38   : > { %p3268_p1 = pnand %p3266_p11, %p4730_p0  ;;  %p3275_p4 = por %p3274_p6, %p3273_p8 }
  0x3a   : > { %p3269_p3 = pneg %p3268_p1 }
  0x3c   : > { %p3276_p10 = pnand %p3275_p4, %p3269_p3 }
  0x3e   : > { %3279 = shalt.err (!%p3276_p10)
}
  0x3f   : > { %s4721_s13 = smov 128   ;;  %s4723_s27 = smov 8  }
  0x40   : > { %3023 = dma.hbm_to_vmem [thread:$0]  (!%p3670_p12), %s4789_s1, 2048, %s267_s19, [#allocation6], %s4721_s13, %s4721_s13, %s4723_s27  }
  0x41   : > { %p3700_p1 = scmp.ge.s32.totalorder %s40_s21, 3  ;;  %p4729_p3 = scmp.eq.s32.totalorder %s3504_s11, 0 }
  0x42   : > { %s120_s23 = sadd.s32 1, %s3472_s26  ;;  %p127_p4 = scmp.ne.s32.totalorder %s3472_s26, %s3468_s25 }
  0x43   : > { %s4790_s22 = scalar_select %p3700_p1, 1, 0 }
  0x44   : > { %s4890_s21 = smov (%p3700_p1, %s40_s21), 0  ;;  %p129_p6 = por %p127_p4, %p4729_p3 }
  0x45   : > { %4791 = sst [smem:[#allocation36_spill]] %s4890_s21  ;;  %p4728_p8 = scmp.lt.s32.totalorder %s3504_s11, 6 }
  0x46   : > { %s3717_s24 = ssub.s32 %s3496_s9, %s4890_s21  ;;  %s316_s19 = sand.u32 1, %s3504_s11  }
  0x47   : > { %p118_p10 = scmp.eq.s32.totalorder %s3717_s24, 0  ;;  %s318_s18 = sand.u32 1, %s3472_s26  }
  0x48   : > { %s4726_s7 = sshll.u32 %s3496_s9, 11  ;;  %s3726_s13 = sshll.u32 %s318_s18, 7 }
  0x49   : > { %s3724_s16 = scalar_select %p118_p10, %s3472_s26, %s120_s23  }
  0x4a   : > { %s4793_s3 = sld [smem:[#allocation65_spill]]  ;;  %p3737_p13 = pnand %p4728_p8, %p129_p6 }
  0x4b   : > { %4792 = sst [smem:[#allocation37_spill]] %s3724_s16  ;;  %s320_s23 = scalar_lea.vmem [#allocation8], %s3726_s13 }
  0x4c   : > { %s4794_s21 = scalar_select %p3737_p13, 1, 0 }
  0x4d   : > { %s327_s18 = sshll.u32 %s320_s23, 4  ;;  %s3744_s16 = scalar_lea.sflag [#allocation9], %s316_s19  ;;  %s3742_s18 = int_to_ptr.vmem [resolvable:$true] %s327_s18 }
  0x4e   : > { %4795 = sst [smem:[#allocation38_spill]] %s4794_s21  ;;  %p4740_p5 = pneg %p3737_p13 }
  0x50   : > { %s3733_s6 = scalar_lea.hbm %s4793_s3, %s4726_s7  ;;  %s3285_s26 = scalar_lea.hbm %s4793_s3, 6144 }
  0x51   : > { %s3280_s1 = scalar_lea.hbm %s3733_s6, 2048  ;;  %p3286_p11 = scmp.lt.u32.totalorder %s3733_s6, %s4793_s3 }
  0x52   : > { %p3281_p2 = scmp.ne.s32.totalorder %s3733_s6, %s3280_s1  ;;  %p3287_p4 = scmp.lt.u32.totalorder %s3285_s26, %s3280_s1 }
  0x53   : > { %p3289_p10 = scmp.lt.u32.totalorder %s3280_s1, %s3733_s6 }
  0x54   : > { %p3283_p7 = pnand %p4740_p5, %p3281_p2  ;;  %p3288_p6 = por %p3287_p4, %p3286_p11 }
  0x56   : > { %p3284_p9 = pneg %p3283_p7  ;;  %p3290_p8 = por %p3289_p10, %p3288_p6 }
  0x58   : > { %p3291_p3 = pnand %p3290_p8, %p3284_p9 }
  0x5a   : > { %3294 = shalt.err (!%p3291_p3)
}
  0x5b   : > { %s3295_s19 = scalar_lea.vmem %s3742_s18, 2048  ;;  %s3509_s7 = smov [#allocation8]  }
  0x5c   : > { %p3296_p2 = scmp.ne.s32.totalorder %s3742_s18, %s3295_s19  ;;  %s3300_s23 = sshll.u32 %s3509_s7, 4  ;;  %s3301_s23 = int_to_ptr.vmem [resolvable:$false] %s3300_s23 }
  0x5d   : > { %s3302_s5 = scalar_lea.vmem %s3301_s23, 4096  ;;  %p3303_p1 = scmp.lt.s32.totalorder %s3742_s18, %s3301_s23 }
  0x5e   : > { %p3298_p7 = pnand %p3296_p2, %p4740_p5  ;;  %p3304_p11 = scmp.lt.s32.totalorder %s3302_s5, %s3295_s19 }
  0x60   : > { %p3299_p0 = pneg %p3298_p7  ;;  %p3305_p4 = por %p3304_p11, %p3303_p1 }
  0x62   : > { %p3306_p6 = pnand %p3305_p4, %p3299_p0 }
  0x64   : > { %3309 = shalt.err (!%p3306_p6)
}
  0x65   : > { %s4796_s26 = smov 8   ;;  %s4797_s8 = smov 128  }
  0x66   : > { %3033 = dma.hbm_to_vmem [thread:$0]  (!%p3737_p13), %s3733_s6, 2048, %s3742_s18, %s3744_s16, %s4797_s8, %s4797_s8, %s4796_s26  }
  0x67   : > { %s4798_s1 = sshll.u32 %s3496_s9, 11  ;;  %s341_s23 = scalar_lea.vmem [#allocation10], %s3726_s13 }
  0x68   : > { %s3780_s19 = scalar_lea.hbm %s4710_s4, %s4798_s1  ;;  %s348_s5 = sshll.u32 %s341_s23, 4  ;;  %s3783_s5 = int_to_ptr.vmem [resolvable:$true] %s348_s5 }
  0x69   : > { %s3510_s3 = smov [#allocation7]   ;;  %s4799_s2 = sld [smem:[#allocation64_spill]] }
  0x6a   : > { %s279_s30 = sshll.u32 %s3510_s3, 4  ;;  %p4800_p1 = pneg %p3670_p12  ;;  %s280_s30 = int_to_ptr.vmem [resolvable:$true] %s279_s30 }
  0x6f   : > { %s3310_s14 = scalar_lea.hbm %s4799_s2, 4096 }
  0x70   : > { %p3311_p0 = scmp.ne.s32.totalorder %s4799_s2, %s3310_s14  ;;  %p3317_p9 = scmp.lt.u32.totalorder %s3310_s14, %s4799_s2 }
  0x72   : > { %p3313_p3 = pnand %p3311_p0, %p4800_p1 }
  0x74   : > { %p3314_p8 = pneg %p3313_p3 }
  0x76   : > { %p3319_p10 = pnand %p3317_p9, %p3314_p8 }
  0x78   : > { %3322 = shalt.err (!%p3319_p10)
}
  0x79   : > { %s3323_s3 = scalar_lea.vmem %s280_s30, 4096  ;;  %p4801_p7 = pmov %p4800_p1 }
  0x7a   : > { %p3324_p2 = scmp.ne.s32.totalorder %s280_s30, %s3323_s3  ;;  %p3331_p6 = scmp.lt.s32.totalorder %s280_s30, %s280_s30 }
  0x7b   : > { %p3332_p5 = scmp.lt.s32.totalorder %s3323_s3, %s3323_s3 }
  0x7c   : > { %p3326_p11 = pnand %p3324_p2, %p4801_p7 }
  0x7d   : > { %p3333_p13 = por %p3332_p5, %p3331_p6 }
  0x7e   : > { %p3327_p4 = pneg %p3326_p11 }
  0x80   : > { %p3334_p0 = pnand %p3333_p13, %p3327_p4 }
  0x82   : > { %3337 = shalt.err (!%p3334_p0)
}
  0x83   : > { %s3511_s25 = smov 256   ;;  %s3512_s14 = smov 16  }
  0x84   : > { %3026 = dma.hbm_to_vmem [thread:$0]  (!%p3670_p12), %s4799_s2, 4096, %s280_s30, [#allocation6], %s3511_s25, %s3511_s25, %s3512_s14  }
  0x85   : > { %s43_s21 = sadd.s32 1, %s3500_s10  ;;  %s52_s18 = sadd.s32 1, %s3484_s29 }
  0x86   : > { %p4802_p13 = scmp.ne.s32.totalorder %s4790_s22, 0  ;;  %p59_p5 = scmp.ne.s32.totalorder %s3484_s29, %s3480_s28 }
  0x87   : > { %s293_s1 = sand.u32 1, %s3484_s29   ;;  %p4803_p3 = scmp.eq.s32.totalorder %s3504_s11, 0 }
  0x88   : > { %s4892_s21 = smov (!%p4802_p13, %s43_s21), %s3500_s10  ;;  %p4805_p9 = scmp.eq.s32.totalorder %s3634_s12, 5 }
  0x89   : > { %p45_p1 = scmp.ge.s32.totalorder %s4892_s21, 2  ;;  %p3815_p8 = por %p4803_p3, %p59_p5 }
  0x8a   : > { %p3821_p10 = por %p4805_p9, %p59_p5  ;;  %s2350_s30 = sshll.u32 %s293_s1, 6 }
  0x8b   : > { %s4894_s21 = smov (%p45_p1, %s4892_s21), 0  ;;  %s2351_s22 = sshll.u32 %s3496_s9, 4 }
  0x8c   : > { %s47_s7 = ssub.s32 %s3500_s10, %s4894_s21  ;;  %s2978_s6 = smul.u32 48, %s3500_s10 }
  0x8d   : > { %s49_s23 = sor.u32 %s3717_s24, %s47_s7  ;;  %s297_s13 = scalar_lea.vmem [#allocation2], %s2350_s30 }
  0x8e   : > { %p50_p12 = scmp.eq.s32.totalorder %s49_s23, 0  ;;  %s306_s3 = sshll.u32 %s297_s13, 4  ;;  %s3832_s3 = int_to_ptr.vmem [resolvable:$true] %s306_s3 }
  0x8f   : > { %s303_s25 = sadd.s32 %s2978_s6, %s2351_s22  ;;  %p4807_p2 = scmp.lt.s32.totalorder %s3504_s11, 6 }
  0x90   : > { %s3835_s14 = scalar_select %p50_p12, %s3484_s29, %s52_s18  }
  0x91   : > { %s2352_s15 = sshll.u32 %s303_s25, 6  ;;  %p3841_p7 = pnand %p4807_p2, %p3815_p8 }
  0x92   : > { %s3848_s24 = scalar_lea.hbm %s4706_s0, %s2352_s15  ;;  %s3850_s18 = scalar_lea.sflag [#allocation3], %s293_s1 }
  0x93   : > { %s3338_s30 = scalar_lea.hbm %s3848_s24, 1024  ;;  %p3340_p4 = pneg %p3841_p7 }
  0x94   : > { %p3339_p11 = scmp.ne.s32.totalorder %s3848_s24, %s3338_s30  ;;  %s3343_s9 = scalar_lea.hbm %s4706_s0, 6144 }
  0x95   : > { %p3344_p13 = scmp.lt.u32.totalorder %s3848_s24, %s4706_s0  ;;  %p3345_p5 = scmp.lt.u32.totalorder %s3343_s9, %s3338_s30 }
  0x96   : > { %p3341_p6 = pnand %p3340_p4, %p3339_p11  ;;  %p3347_p3 = scmp.lt.u32.totalorder %s3338_s30, %s3848_s24 }
  0x97   : > { %p3346_p1 = por %p3345_p5, %p3344_p13 }
  0x98   : > { %p3342_p0 = pneg %p3341_p6 }
  0x99   : > { %p3348_p8 = por %p3347_p3, %p3346_p1 }
  0x9b   : > { %p3349_p9 = pnand %p3348_p8, %p3342_p0 }
  0x9d   : > { %3352 = shalt.err (!%p3349_p9)
}
  0x9e   : > { %s3353_s1 = scalar_lea.vmem %s3832_s3, 1024  ;;  %s3513_s23 = smov [#allocation2]  }
  0x9f   : > { %p3354_p12 = scmp.ne.s32.totalorder %s3832_s3, %s3353_s1  ;;  %s3358_s6 = sshll.u32 %s3513_s23, 4  ;;  %s3359_s6 = int_to_ptr.vmem [resolvable:$false] %s3358_s6 }
  0xa0   : > { %s3360_s13 = scalar_lea.vmem %s3359_s6, 2048  ;;  %p3361_p6 = scmp.lt.s32.totalorder %s3832_s3, %s3359_s6 }
  0xa1   : > { %p3356_p2 = pnand %p3354_p12, %p3340_p4  ;;  %p3362_p13 = scmp.lt.s32.totalorder %s3360_s13, %s3353_s1 }
  0xa3   : > { %p3357_p11 = pneg %p3356_p2  ;;  %p3363_p5 = por %p3362_p13, %p3361_p6 }
  0xa5   : > { %p3364_p1 = pnand %p3363_p5, %p3357_p11 }
  0xa7   : > { %3367 = shalt.err (!%p3364_p1)
}
  0xa8   : > { %s3514_s25 = smov 64   ;;  %s4809_s15 = sld [smem:[#allocation38_spill]] }
  0xa9   : > { %s3515_s30 = smov 4   ;;  %s3368_s27 = scalar_lea.hbm %s3780_s19, 2048 }
  0xaa   : > { %3030 = dma.hbm_to_vmem [thread:$0]  (!%p3841_p7), %s3848_s24, 1024, %s3832_s3, %s3850_s18, %s3514_s25, %s3514_s25, %s3515_s30  }
  0xab   : > { %p3369_p4 = scmp.ne.s32.totalorder %s3780_s19, %s3368_s27  ;;  %s3373_s22 = scalar_lea.hbm %s4710_s4, 6144 }
  0xac   : > { %p3374_p12 = scmp.lt.u32.totalorder %s3780_s19, %s4710_s4  ;;  %p3375_p2 = scmp.lt.u32.totalorder %s3373_s22, %s3368_s27 }
  0xad   : > { %p3377_p6 = scmp.lt.u32.totalorder %s3368_s27, %s3780_s19 }
  0xae   : > { %p4810_p0 = scmp.ne.s32.totalorder %s4809_s15, 0  ;;  %p3376_p11 = por %p3375_p2, %p3374_p12 }
  0xb0   : > { %p4811_p3 = pneg %p4810_p0  ;;  %p3378_p13 = por %p3377_p6, %p3376_p11 }
  0xb2   : > { %p3371_p8 = pnand %p3369_p4, %p4811_p3 }
  0xb4   : > { %p3372_p9 = pneg %p3371_p8 }
  0xb6   : > { %p3379_p5 = pnand %p3378_p13, %p3372_p9 }
  0xb8   : > { %3382 = shalt.err (!%p3379_p5)
}
  0xb9   : > { %s3383_s3 = scalar_lea.vmem %s3783_s5, 2048  ;;  %p4812_p1 = pmov %p4811_p3 }
  0xba   : > { %p3384_p7 = scmp.ne.s32.totalorder %s3783_s5, %s3383_s3  ;;  %s3516_s17 = smov [#allocation10]  }
  0xbb   : > { %s3388_s24 = sshll.u32 %s3516_s17, 4  ;;  %s3389_s24 = int_to_ptr.vmem [resolvable:$false] %s3388_s24 }
  0xbc   : > { %p3386_p4 = pnand %p3384_p7, %p4812_p1  ;;  %s3390_s18 = scalar_lea.vmem %s3389_s24, 4096 }
  0xbd   : > { %p3391_p8 = scmp.lt.s32.totalorder %s3783_s5, %s3389_s24  ;;  %p3392_p12 = scmp.lt.s32.totalorder %s3390_s18, %s3383_s3 }
  0xbe   : > { %p3387_p3 = pneg %p3386_p4 }
  0xbf   : > { %p3393_p2 = por %p3392_p12, %p3391_p8 }
  0xc1   : > { %p3394_p11 = pnand %p3393_p2, %p3387_p3 }
  0xc3   : > { %3397 = shalt.err (!%p3394_p11)
}
  0xc4   : > { %3036 = dma.hbm_to_vmem [thread:$0]  (!%p4810_p0), %s3780_s19, 2048, %s3783_s5, %s3744_s16, %s4797_s8, %s4797_s8, %s4796_s26  }
  0xc5   : > { %s4813_s23 = sld [smem:[#allocation35_spill]] }
  0xcb   : > { %p4814_p9 = scmp.ne.s32.totalorder %s4813_s23, 0 }
  0xcd   : > { %360 = sbr.rel (%p4814_p9) target bundleno = 758 (0x2f6), region = 40 }
  0xd4   : > { %s4815_s6 = sld [smem:[#allocation32_spill]]  ;;  %s3908_s13 = sand.u32 1, %s3480_s28  }
  0xd5   : > { %s2360_s25 = sshll.u32 %s3908_s13, 6  ;;  %s363_s30 = scalar_lea.sflag [#allocation3], %s3908_s13 }
  0xd6   : > { %s3912_s27 = scalar_lea.vmem [#allocation2], %s2360_s25 }
  0xda   : > { %p4816_p6 = scmp.ne.s32.totalorder %s4815_s6, 0 }
  0xdc   : > { %3443 = dma.done.wait (%p4816_p6), %s363_s30, 1024  }
  0xdd   : > { %3445 = vsyncadd (%p4816_p6), %s363_s30, 4294966272  ;;  %p4817_p0 = scmp.eq.s32.totalorder %s3634_s12, 0 }
  0xdf   : > { %3447 = dma.done.wait (%p4817_p0), [#allocation6], 6144   ;;  %p4818_p13 = pmov %p4817_p0 }
  0xe0   : > { %s4819_s16 = sld [smem:[#allocation26_spill]]  ;;  %s4820_s26 = sld [smem:[#allocation33_spill]] }
  0xe1   : > { %3449 = vsyncadd (%p4818_p13), [#allocation6], 4294961152  ;;  %s379_s8 = sand.u32 1, %s3634_s12  }
  0xe2   : > { %s380_s15 = scalar_lea.sflag [#allocation9], %s379_s8 }
  0xe6   : > { %s381_s19 = sand.u32 1, %s4819_s16   ;;  %p4821_p5 = scmp.ne.s32.totalorder %s4820_s26, 0 }
  0xe7   : > { %s3924_s5 = sshll.u32 %s381_s19, 7 }
  0xe8   : > { %s3929_s2 = scalar_lea.vmem [#allocation8], %s3924_s5 }
  0xe9   : > { %3451 = dma.done.wait (%p4821_p5), %s380_s15, 4096  }
  0xea   : > { %3453 = vsyncadd (%p4821_p5), %s380_s15, 4294963200  ;;  %v3517_v0 = vmov 0   ;;  %v3172_v1 = vld [vmem:[#allocation5 + $0x4] ss:$8 sps:$4 sm:$0xff]   ;;  %v3174_v2 = vld [vmem:[#allocation5] ss:$8 sps:$4 sm:$0xff]  }
  0xeb   : > { %642 = vmatprep.mubr.bf16.mxu0 %v3517_v0  ;;  %682 = vmatprep.mubr.bf16.mxu1 %v3517_v0  ;;  %v3175_v3 = vld [vmem:[#allocation5 + $0x14] ss:$8 sps:$4 sm:$0xff]   ;;  %v3177_v4 = vld [vmem:[#allocation5 + $0x10] ss:$8 sps:$4 sm:$0xff]   ;;  %v3178_v5 = vld [vmem:[#allocation5 + $0x24] ss:$8 sps:$4 sm:$0xff]  }
  0xec   : > { %610 = vmatprep.subr.bf16.mxu0 %v3172_v1  ;;  %2962 = vmatprep.subr.bf16.mxu1 %v3172_v1  ;;  %v3180_v6 = vld [vmem:[#allocation5 + $0x20] ss:$8 sps:$4 sm:$0xff]   ;;  %v3181_v7 = vld [vmem:[#allocation5 + $0x34] ss:$8 sps:$4 sm:$0xff]   ;;  %v3183_v8 = vld [vmem:[#allocation5 + $0x30] ss:$8 sps:$4 sm:$0xff]  }
  0xed   : > { %611 = vmatpush1.bf16.msra.mxu0 %v3174_v2  ;;  %2970 = vmatpush1.bf16.msra.mxu1 %v3174_v2  ;;  %v3184_v9 = vld [vmem:[#allocation5 + $0x44] ss:$8 sps:$4 sm:$0xff]   ;;  %v3186_v10 = vld [vmem:[#allocation5 + $0x40] ss:$8 sps:$4 sm:$0xff]   ;;  %v3187_v11 = vld [vmem:[#allocation5 + $0x54] ss:$8 sps:$4 sm:$0xff]  }
  0xee   : > { %612 = vmatprep.subr.bf16.mxu0 %v3175_v3  ;;  %2963 = vmatprep.subr.bf16.mxu1 %v3175_v3  ;;  %v3189_v12 = vld [vmem:[#allocation5 + $0x50] ss:$8 sps:$4 sm:$0xff]   ;;  %v3190_v13 = vld [vmem:[#allocation5 + $0x64] ss:$8 sps:$4 sm:$0xff]   ;;  %v3192_v14 = vld [vmem:[#allocation5 + $0x60] ss:$8 sps:$4 sm:$0xff]  }
  0xef   : > { %v3193_v15 = vld [vmem:[#allocation5 + $0x74] ss:$8 sps:$4 sm:$0xff]   ;;  %v3195_v16 = vld [vmem:[#allocation5 + $0x70] ss:$8 sps:$4 sm:$0xff]   ;;  %v3938_v18 = vld [vmem:[%s3912_s27] sm:$0xff]   ;;  %s3518_s9 = smov 64  }
  0xf0   : > { %v3203_v17 = vld [vmem:[#allocation7 + $0x4] ss:$16 sps:$4 sm:$0xff]   ;;  %v3230_v20 = vld [vmem:[#allocation7 + $0xc] ss:$16 sps:$4 sm:$0xff]   ;;  %v3201_v21 = vld [vmem:[#allocation7] ss:$16 sps:$4 sm:$0xff]  }
  0xf1   : > { %613 = vmatpush1.bf16.msra.mxu0 %v3177_v4  ;;  %2971 = vmatpush1.bf16.msra.mxu1 %v3177_v4  ;;  %v3941_v19 = vld [vmem:[%s3912_s27 + $0x20] sm:$0xff]   ;;  %v3228_v23 = vld [vmem:[#allocation7 + $0x8] ss:$16 sps:$4 sm:$0xff]   ;;  %v3233_v24 = vld [vmem:[#allocation7 + $0x2c] ss:$16 sps:$4 sm:$0xff]   ;;  %s4147_s22 = sshll.u32 %s3908_s13, 7 }
  0xf2   : > { %614 = vmatprep.subr.bf16.mxu0 %v3178_v5  ;;  %2964 = vmatprep.subr.bf16.mxu1 %v3178_v5  ;;  %v3207_v22 = vld [vmem:[#allocation7 + $0x24] ss:$16 sps:$4 sm:$0xff]   ;;  %v3205_v25 = vld [vmem:[#allocation7 + $0x20] ss:$16 sps:$4 sm:$0xff]   ;;  %v3231_v27 = vld [vmem:[#allocation7 + $0x28] ss:$16 sps:$4 sm:$0xff]  }
  0xf3   : > { %v3210_v26 = vld [vmem:[#allocation7 + $0x44] ss:$16 sps:$4 sm:$0xff]   ;;  %v3236_v28 = vld [vmem:[#allocation7 + $0x4c] ss:$16 sps:$4 sm:$0xff]   ;;  %v3208_v31 = vld [vmem:[#allocation7 + $0x40] ss:$16 sps:$4 sm:$0xff]  }
  0xf4   : > { %v3948_v29 = vld [vmem:[%s3912_s27 + $0x8] sm:$0xff]   ;;  %v3213_v33 = vld [vmem:[#allocation7 + $0x64] ss:$16 sps:$4 sm:$0xff]   ;;  %v3211_v35 = vld [vmem:[#allocation7 + $0x60] ss:$16 sps:$4 sm:$0xff]   ;;  %s4154_s7 = scalar_lea.vmem [#allocation14], %s4147_s22 }
  0xf5   : > { %615 = vmatpush1.bf16.msra.mxu0 %v3180_v6  ;;  %2972 = vmatpush1.bf16.msra.mxu1 %v3180_v6  ;;  %v3951_v30 = vld [vmem:[%s3912_s27 + $0x28] sm:$0xff]   ;;  %v3217_v37 = vld [vmem:[#allocation7 + $0x84] ss:$16 sps:$4 sm:$0xff]   ;;  %v3215_v41 = vld [vmem:[#allocation7 + $0x80] ss:$16 sps:$4 sm:$0xff]   ;;  %s4257_s1 = scalar_lea.vmem [#allocation10], %s3924_s5 }
  0xf6   : > { %616 = vmatprep.subr.bf16.mxu0 %v3181_v7  ;;  %2965 = vmatprep.subr.bf16.mxu1 %v3181_v7  ;;  %v3234_v32 = vld [vmem:[#allocation7 + $0x48] ss:$16 sps:$4 sm:$0xff]   ;;  %v3239_v34 = vld [vmem:[#allocation7 + $0x6c] ss:$16 sps:$4 sm:$0xff]   ;;  %v3200_v39 = vld [vmem:[%s3912_s27 + $0x10] sm:$0xff]   ;;  %s4308_s3 = scalar_lea.vmem [#allocation11], %s4147_s22 }
  0xf7   : > { %v3237_v36 = vld [vmem:[#allocation7 + $0x68] ss:$16 sps:$4 sm:$0xff]   ;;  %v3242_v38 = vld [vmem:[#allocation7 + $0x8c] ss:$16 sps:$4 sm:$0xff]   ;;  %v3959_v40 = vld [vmem:[%s3912_s27 + $0x30] sm:$0xff]   ;;  %s4497_s17 = scalar_lea.vmem [#allocation12], %s4147_s22 }
  0xf8   : > { %v3240_v42 = vld [vmem:[#allocation7 + $0x88] ss:$16 sps:$4 sm:$0xff]   ;;  %v3221_v43 = vld [vmem:[#allocation7 + $0xa4] ss:$16 sps:$4 sm:$0xff]   ;;  %v3245_v44 = vld [vmem:[#allocation7 + $0xac] ss:$16 sps:$4 sm:$0xff]  }
  0xf9   : > { %617 = vmatpush1.bf16.msra.mxu0 %v3183_v8  ;;  %2973 = vmatpush1.bf16.msra.mxu1 %v3183_v8  ;;  %v3219_v45 = vld [vmem:[#allocation7 + $0xa0] ss:$16 sps:$4 sm:$0xff]   ;;  %v3243_v46 = vld [vmem:[#allocation7 + $0xa8] ss:$16 sps:$4 sm:$0xff]   ;;  %v3224_v47 = vld [vmem:[#allocation7 + $0xc4] ss:$16 sps:$4 sm:$0xff]  }
  0xfa   : > { %618 = vmatprep.subr.bf16.mxu0 %v3184_v9  ;;  %2966 = vmatprep.subr.bf16.mxu1 %v3184_v9  ;;  %v3248_v48 = vld [vmem:[#allocation7 + $0xcc] ss:$16 sps:$4 sm:$0xff]   ;;  %v3222_v51 = vld [vmem:[#allocation7 + $0xc0] ss:$16 sps:$4 sm:$0xff]   ;;  %v3246_v52 = vld [vmem:[#allocation7 + $0xc8] ss:$16 sps:$4 sm:$0xff]  }
  0xfb   : > { %v3214_v49 = vld [vmem:[%s3912_s27 + $0x18] sm:$0xff]   ;;  %v3227_v53 = vld [vmem:[#allocation7 + $0xe4] ss:$16 sps:$4 sm:$0xff]   ;;  %v3225_v55 = vld [vmem:[#allocation7 + $0xe0] ss:$16 sps:$4 sm:$0xff]   ;;  %s1977_s24 = scalar_lea.sflag [#allocation4], %s3908_s13 }
  0xfc   : > { %v3218_v50 = vld [vmem:[%s3912_s27 + $0x38] sm:$0xff]   ;;  %s4602_s18 = scalar_lea.sflag [#allocation13], %s379_s8 }
  0xfd   : > { %619 = vmatpush1.bf16.msra.mxu0 %v3186_v10  ;;  %2974 = vmatpush1.bf16.msra.mxu1 %v3186_v10  ;;  %v3251_v54 = vld [vmem:[#allocation7 + $0xec] ss:$16 sps:$4 sm:$0xff]   ;;  %v3249_v56 = vld [vmem:[#allocation7 + $0xe8] ss:$16 sps:$4 sm:$0xff]  }
  0xfe   : > { %620 = vmatprep.subr.bf16.mxu0 %v3187_v11  ;;  %2967 = vmatprep.subr.bf16.mxu1 %v3187_v11 }
 0x101   : > { %621 = vmatpush1.bf16.msra.mxu0 %v3189_v12  ;;  %2975 = vmatpush1.bf16.msra.mxu1 %v3189_v12 }
 0x102   : > { %622 = vmatprep.subr.bf16.mxu0 %v3190_v13  ;;  %2968 = vmatprep.subr.bf16.mxu1 %v3190_v13 }
 0x105   : > { %623 = vmatpush1.bf16.msra.mxu0 %v3192_v14  ;;  %2976 = vmatpush1.bf16.msra.mxu1 %v3192_v14 }
 0x106   : > { %624 = vmatprep.subr.bf16.mxu0 %v3193_v15  ;;  %2969 = vmatprep.subr.bf16.mxu1 %v3193_v15 }
 0x109   : > { %625 = vmatpush1.bf16.msra.mxu0 %v3195_v16  ;;  %2977 = vmatpush1.bf16.msra.mxu1 %v3195_v16 }
 0x10a   : > { %915 = vmatprep.subr.bf16.mxu1 %v3203_v17  ;;  %1028 = vmatprep.subr.bf16.mxu0 %v3230_v20 }
 0x10c   : > { %643 = vmatmul.mubr.bf16.vlgmr.msra.gmra.mrb[0].mxu0 %v3938_v18  ;;  %683 = vmatmul.mubr.bf16.vlgmr.msra.gmra.mrb[0].mxu1 %v3941_v19 }
 0x10d   : > { %652 = vmatprep.mubr.bf16.mxu0 %v3517_v0  ;;  %692 = vmatprep.mubr.bf16.mxu1 %v3517_v0 }
 0x10e   : > { %916 = vmatpush1.bf16.msra.mxu1 %v3201_v21  ;;  %1029 = vmatpush1.bf16.msra.mxu0 %v3228_v23 }
 0x10f   : > { %917 = vmatprep.subr.bf16.mxu1 %v3207_v22  ;;  %1030 = vmatprep.subr.bf16.mxu0 %v3233_v24 }
 0x112   : > { %918 = vmatpush1.bf16.msra.mxu1 %v3205_v25  ;;  %1031 = vmatpush1.bf16.msra.mxu0 %v3231_v27 }
 0x113   : > { %919 = vmatprep.subr.bf16.mxu1 %v3210_v26  ;;  %1032 = vmatprep.subr.bf16.mxu0 %v3236_v28 }
 0x114   : > { %653 = vmatmul.mubr.bf16.gmra.mrb[4].mxu0 %v3948_v29  ;;  %693 = vmatmul.mubr.bf16.gmra.mrb[4].mxu1 %v3951_v30 }
 0x115   : > { %662 = vmatprep.mubr.bf16.mxu0 %v3517_v0  ;;  %702 = vmatprep.mubr.bf16.mxu1 %v3517_v0 }
 0x116   : > { %920 = vmatpush1.bf16.msra.mxu1 %v3208_v31  ;;  %1033 = vmatpush1.bf16.msra.mxu0 %v3234_v32 }
 0x117   : > { %921 = vmatprep.subr.bf16.mxu1 %v3213_v33  ;;  %1034 = vmatprep.subr.bf16.mxu0 %v3239_v34 }
 0x11a   : > { %922 = vmatpush1.bf16.msra.mxu1 %v3211_v35  ;;  %1035 = vmatpush1.bf16.msra.mxu0 %v3237_v36 }
 0x11b   : > { %923 = vmatprep.subr.bf16.mxu1 %v3217_v37  ;;  %1036 = vmatprep.subr.bf16.mxu0 %v3242_v38 }
 0x11c   : > { %663 = vmatmul.mubr.bf16.gmra.mrb[8].mxu0 %v3200_v39  ;;  %703 = vmatmul.mubr.bf16.gmra.mrb[8].mxu1 %v3959_v40 }
 0x11d   : > { %672 = vmatprep.mubr.bf16.mxu0 %v3517_v0  ;;  %712 = vmatprep.mubr.bf16.mxu1 %v3517_v0 }
 0x11e   : > { %924 = vmatpush1.bf16.msra.mxu1 %v3215_v41  ;;  %1037 = vmatpush1.bf16.msra.mxu0 %v3240_v42 }
 0x11f   : > { %925 = vmatprep.subr.bf16.mxu1 %v3221_v43  ;;  %1038 = vmatprep.subr.bf16.mxu0 %v3245_v44 }
 0x122   : > { %926 = vmatpush1.bf16.msra.mxu1 %v3219_v45  ;;  %1039 = vmatpush1.bf16.msra.mxu0 %v3243_v46 }
 0x123   : > { %927 = vmatprep.subr.bf16.mxu1 %v3224_v47  ;;  %1040 = vmatprep.subr.bf16.mxu0 %v3248_v48 }
 0x124   : > { %673 = vmatmul.mubr.bf16.gmra.mrb[12].mxu0 %v3214_v49  ;;  %713 = vmatmul.mubr.bf16.gmra.mrb[12].mxu1 %v3218_v50 }
 0x125   : > { %947 = vmatprep.mubr.bf16.mxu1 %v3517_v0  ;;  %1060 = vmatprep.mubr.bf16.mxu0 %v3517_v0 }
 0x126   : > { %928 = vmatpush1.bf16.msra.mxu1 %v3222_v51  ;;  %1041 = vmatpush1.bf16.msra.mxu0 %v3246_v52 }
 0x127   : > { %929 = vmatprep.subr.bf16.mxu1 %v3227_v53  ;;  %1042 = vmatprep.subr.bf16.mxu0 %v3251_v54 }
 0x12a   : > { %930 = vmatpush1.bf16.msra.mxu1 %v3225_v55  ;;  %1043 = vmatpush1.bf16.msra.mxu0 %v3249_v56 }
 0x12d   : > { %948 = vmatmul.mubr.bf16.vlgmr.msra.gmra.mrb[16].mxu1 %v3938_v18  ;;  %1061 = vmatmul.mubr.bf16.vlgmr.msra.gmra.mrb[16].mxu0 %v3938_v18 }
 0x12e   : > { %957 = vmatprep.mubr.bf16.mxu1 %v3517_v0  ;;  %1070 = vmatprep.mubr.bf16.mxu0 %v3517_v0 }
 0x135   : > { %958 = vmatmul.mubr.bf16.gmra.mrb[20].mxu1 %v3948_v29  ;;  %1071 = vmatmul.mubr.bf16.gmra.mrb[20].mxu0 %v3948_v29 }
 0x136   : > { %967 = vmatprep.mubr.bf16.mxu1 %v3517_v0  ;;  %1080 = vmatprep.mubr.bf16.mxu0 %v3517_v0 }
 0x13d   : > { %968 = vmatmul.mubr.bf16.gmra.mrb[24].mxu1 %v3200_v39  ;;  %1081 = vmatmul.mubr.bf16.gmra.mrb[24].mxu0 %v3200_v39 }
 0x13e   : > { %977 = vmatprep.mubr.bf16.mxu1 %v3517_v0  ;;  %1090 = vmatprep.mubr.bf16.mxu0 %v3517_v0 }
 0x145   : > { %978 = vmatmul.mubr.bf16.gmra.mrb[28].mxu1 %v3214_v49  ;;  %1091 = vmatmul.mubr.bf16.gmra.mrb[28].mxu0 %v3214_v49 }
 0x146   : > { %987 = vmatprep.mubr.bf16.mxu1 %v3517_v0  ;;  %1100 = vmatprep.mubr.bf16.mxu0 %v3517_v0 }
 0x14d   : > { %988 = vmatmul.mubr.bf16.gmra.mrb[32].mxu1 %v3941_v19  ;;  %1101 = vmatmul.mubr.bf16.gmra.mrb[32].mxu0 %v3941_v19 }
 0x14e   : > { %997 = vmatprep.mubr.bf16.mxu1 %v3517_v0  ;;  %1110 = vmatprep.mubr.bf16.mxu0 %v3517_v0 }
 0x155   : > { %998 = vmatmul.mubr.bf16.gmra.mrb[36].mxu1 %v3951_v30  ;;  %1111 = vmatmul.mubr.bf16.gmra.mrb[36].mxu0 %v3951_v30 }
 0x156   : > { %1007 = vmatprep.mubr.bf16.mxu1 %v3517_v0  ;;  %1120 = vmatprep.mubr.bf16.mxu0 %v3517_v0 }
 0x15d   : > { %1008 = vmatmul.mubr.bf16.gmra.mrb[40].mxu1 %v3959_v40  ;;  %1121 = vmatmul.mubr.bf16.gmra.mrb[40].mxu0 %v3959_v40 }
 0x15e   : > { %1017 = vmatprep.mubr.bf16.mxu1 %v3517_v0  ;;  %1130 = vmatprep.mubr.bf16.mxu0 %v3517_v0 }
 0x165   : > { %1018 = vmatmul.mubr.bf16.gmra.mrb[44].mxu1 %v3218_v50  ;;  %1131 = vmatmul.mubr.bf16.gmra.mrb[44].mxu0 %v3218_v50 }
 0x1df   : > { %v3992_v57 = vpop.f32.mrb[0].mxu0  ;;  %v3994_v58 = vpop.f32.mrb[0].mxu1 }
 0x1e0   : > { %v3996_v59 = vpop.f32.mrb[1].mxu1  ;;  %1189 = vrot.lane.b32.xlu0 %v3992_v57, %s3518_s9  ;;  %v4000_v60 = vpop.f32.mrb[1].mxu0 }
 0x1e1   : > { %v4002_v61 = vpop.f32.mrb[2].mxu0  ;;  %v4004_v62 = vpop.f32.mrb[2].mxu1 }
 0x1e2   : > { %1207 = vrot.lane.b32.xlu1 %v4004_v62, %s3518_s9  ;;  %v4008_v63 = vpop.f32.mrb[3].mxu0  ;;  %v4010_v0 = vpop.f32.mrb[3].mxu1 }
 0x1e4   : > { %1205 = vrot.lane.b32.xlu0 %v3994_v58, %s3518_s9 }
 0x1e6   : > { %1591 = vrot.lane.b32.xlu1 %v4008_v63, %s3518_s9 }
 0x1e7   : > { %v4016_v1 = vpop.f32.mrb[4].mxu0  ;;  %v4018_v2 = vpop.f32.mrb[4].mxu1 }
 0x1e8   : > { %1589 = vrot.lane.b32.xlu0 %v4000_v60, %s3518_s9  ;;  %v4022_v3 = vpop.f32.mrb[5].mxu0  ;;  %v4024_v4 = vpop.f32.mrb[5].mxu1 }
 0x1e9   : > { %v4026_v5 = vpop.f32.mrb[6].mxu0  ;;  %v4028_v6 = vpop.f32.mrb[6].mxu1 }
 0x1ea   : > { %1607 = vrot.lane.b32.xlu1 %v4010_v0, %s3518_s9  ;;  %v4032_v7 = vpop.f32.mrb[7].mxu0  ;;  %v4034_v8 = vpop.f32.mrb[7].mxu1 }
 0x1ec   : > { %1605 = vrot.lane.b32.xlu0 %v3996_v59, %s3518_s9 }
 0x1ee   : > { %1193 = vrot.lane.b32.xlu1 %v4016_v1, %s3518_s9 }
 0x1ef   : > { %v4040_v9 = vpop.f32.mrb[8].mxu0  ;;  %v4042_v10 = vpop.f32.mrb[8].mxu1 }
 0x1f0   : > { %1191 = vrot.lane.b32.xlu0 %v4002_v61, %s3518_s9  ;;  %v4046_v11 = vpop.f32.mrb[9].mxu0  ;;  %v4048_v12 = vpop.f32.mrb[9].mxu1 }
 0x1f1   : > { %v4050_v13 = vpop.f32.mrb[10].mxu0  ;;  %v4052_v14 = vpop.f32.mrb[10].mxu1 }
 0x1f2   : > { %1195 = vrot.lane.b32.xlu1 %v4026_v5, %s3518_s9  ;;  %v4056_v15 = vpop.f32.mrb[11].mxu0  ;;  %v4058_v16 = vpop.f32.mrb[11].mxu1 }
 0x1f4   : > { %1209 = vrot.lane.b32.xlu0 %v4018_v2, %s3518_s9 }
 0x1f6   : > { %1211 = vrot.lane.b32.xlu1 %v4028_v6, %s3518_s9 }
 0x1f7   : > { %v4064_v17 = vpop.f32.mrb[12].mxu0  ;;  %v4066_v18 = vpop.f32.mrb[12].mxu1 }
 0x1f8   : > { %1593 = vrot.lane.b32.xlu0 %v4022_v3, %s3518_s9  ;;  %v4070_v19 = vpop.f32.mrb[13].mxu0  ;;  %v4072_v20 = vpop.f32.mrb[13].mxu1 }
 0x1f9   : > { %v4074_v21 = vpop.f32.mrb[14].mxu0  ;;  %v4076_v22 = vpop.f32.mrb[14].mxu1 }
 0x1fa   : > { %1595 = vrot.lane.b32.xlu1 %v4032_v7, %s3518_s9  ;;  %v4080_v23 = vpop.f32.mrb[15].mxu0  ;;  %v4082_v24 = vpop.f32.mrb[15].mxu1 }
 0x1fc   : > { %1609 = vrot.lane.b32.xlu0 %v4024_v4, %s3518_s9 }
 0x1fe   : > { %1611 = vrot.lane.b32.xlu1 %v4034_v8, %s3518_s9 }
 0x200   : > { %1197 = vrot.lane.b32.xlu0 %v4040_v9, %s3518_s9  ;;  %v4090_v25 = vpop.f32.mrb[16].mxu1  ;;  %v1062_v37 = vpop.f32.mrb[16].mxu0 }
 0x201   : > { %v4092_v26 = vpop.f32.mrb[17].mxu1  ;;  %v1064_v38 = vpop.f32.mrb[17].mxu0 }
 0x202   : > { %1199 = vrot.lane.b32.xlu1 %v4050_v13, %s3518_s9  ;;  %v4096_v27 = vpop.f32.mrb[18].mxu1  ;;  %v1066_v40 = vpop.f32.mrb[18].mxu0 }
 0x203   : > { %v4098_v28 = vpop.f32.mrb[19].mxu1  ;;  %v1068_v42 = vpop.f32.mrb[19].mxu0  ;;  %v2760_v44 = vpack.c.bf16 %v1066_v40, %v1062_v37 }
 0x204   : > { %1213 = vrot.lane.b32.xlu0 %v4042_v10, %s3518_s9  ;;  %v2880_v45 = vpack.c.bf16 %v1068_v42, %v1064_v38 }
 0x205   : > { %2761 = vst [vmem:[%s4154_s7] sm:$0xff] %v2760_v44  }
 0x206   : > { %1215 = vrot.lane.b32.xlu1 %v4052_v14, %s3518_s9  ;;  %2954 = vst [vmem:[%s4154_s7 + $0x40] sm:$0xff] %v2880_v45  }
 0x208   : > { %1597 = vrot.lane.b32.xlu0 %v4046_v11, %s3518_s9  ;;  %v4106_v29 = vpop.f32.mrb[20].mxu1  ;;  %v1072_v47 = vpop.f32.mrb[20].mxu0 }
 0x209   : > { %v4108_v30 = vpop.f32.mrb[21].mxu1  ;;  %v1074_v48 = vpop.f32.mrb[21].mxu0 }
 0x20a   : > { %4822 = vst [vmem:[#allocation39_spill] sm:$0xff] %v4108_v30  ;;  %1599 = vrot.lane.b32.xlu1 %v4056_v15, %s3518_s9  ;;  %v4112_v31 = vpop.f32.mrb[22].mxu1  ;;  %v1076_v50 = vpop.f32.mrb[22].mxu0 }
 0x20b   : > { %4823 = vst [vmem:[#allocation40_spill] sm:$0xff] %v4112_v31  ;;  %v4114_v32 = vpop.f32.mrb[23].mxu1  ;;  %v1078_v52 = vpop.f32.mrb[23].mxu0  ;;  %v2765_v54 = vpack.c.bf16 %v1076_v50, %v1072_v47 }
 0x20c   : > { %4824 = vst [vmem:[#allocation41_spill] sm:$0xff] %v4114_v32  ;;  %1613 = vrot.lane.b32.xlu0 %v4048_v12, %s3518_s9  ;;  %v2885_v55 = vpack.c.bf16 %v1078_v52, %v1074_v48 }
 0x20d   : > { %2931 = vst [vmem:[%s4154_s7 + $0x8] sm:$0xff] %v2765_v54  }
 0x20e   : > { %1615 = vrot.lane.b32.xlu1 %v4058_v16, %s3518_s9  ;;  %2955 = vst [vmem:[%s4154_s7 + $0x48] sm:$0xff] %v2885_v55  }
 0x210   : > { %1201 = vrot.lane.b32.xlu0 %v4064_v17, %s3518_s9  ;;  %v4122_v33 = vpop.f32.mrb[24].mxu1  ;;  %v1082_v37 = vpop.f32.mrb[24].mxu0 }
 0x211   : > { %4825 = vst [vmem:[#allocation42_spill] sm:$0xff] %v4122_v33  ;;  %v4124_v34 = vpop.f32.mrb[25].mxu1  ;;  %v1084_v38 = vpop.f32.mrb[25].mxu0 }
 0x212   : > { %4826 = vst [vmem:[#allocation43_spill] sm:$0xff] %v4124_v34  ;;  %1203 = vrot.lane.b32.xlu1 %v4074_v21, %s3518_s9  ;;  %v4128_v35 = vpop.f32.mrb[26].mxu1  ;;  %v1086_v42 = vpop.f32.mrb[26].mxu0 }
 0x213   : > { %4827 = vst [vmem:[#allocation44_spill] sm:$0xff] %v4128_v35  ;;  %v4130_v36 = vpop.f32.mrb[27].mxu1  ;;  %v1088_v45 = vpop.f32.mrb[27].mxu0  ;;  %v2770_v48 = vpack.c.bf16 %v1086_v42, %v1082_v37 }
 0x214   : > { %4828 = vst [vmem:[#allocation45_spill] sm:$0xff] %v4130_v36  ;;  %1217 = vrot.lane.b32.xlu0 %v4066_v18, %s3518_s9  ;;  %v2890_v50 = vpack.c.bf16 %v1088_v45, %v1084_v38 }
 0x215   : > { %2932 = vst [vmem:[%s4154_s7 + $0x10] sm:$0xff] %v2770_v48  }
 0x216   : > { %1219 = vrot.lane.b32.xlu1 %v4076_v22, %s3518_s9  ;;  %2956 = vst [vmem:[%s4154_s7 + $0x50] sm:$0xff] %v2890_v50  }
 0x218   : > { %1601 = vrot.lane.b32.xlu0 %v4070_v19, %s3518_s9  ;;  %v4138_v39 = vpop.f32.mrb[28].mxu1  ;;  %v1092_v54 = vpop.f32.mrb[28].mxu0 }
 0x219   : > { %4829 = vst [vmem:[#allocation46_spill] sm:$0xff] %v4138_v39  ;;  %v4140_v41 = vpop.f32.mrb[29].mxu1  ;;  %v1094_v55 = vpop.f32.mrb[29].mxu0 }
 0x21a   : > { %1603 = vrot.lane.b32.xlu1 %v4080_v23, %s3518_s9  ;;  %v4144_v43 = vpop.f32.mrb[30].mxu1  ;;  %v1096_v37 = vpop.f32.mrb[30].mxu0 }
 0x21b   : > { %4830 = vst [vmem:[#allocation47_spill] sm:$0xff] %v4144_v43  ;;  %v4149_v46 = vpop.f32.mrb[31].mxu1  ;;  %v1098_v42 = vpop.f32.mrb[31].mxu0  ;;  %v2775_v48 = vpack.c.bf16 %v1096_v37, %v1092_v54 }
 0x21c   : > { %1617 = vrot.lane.b32.xlu0 %v4072_v20, %s3518_s9  ;;  %v2895_v50 = vpack.c.bf16 %v1098_v42, %v1094_v55 }
 0x21d   : > { %2933 = vst [vmem:[%s4154_s7 + $0x18] sm:$0xff] %v2775_v48  }
 0x21e   : > { %1619 = vrot.lane.b32.xlu1 %v4082_v24, %s3518_s9  ;;  %2957 = vst [vmem:[%s4154_s7 + $0x58] sm:$0xff] %v2895_v50  }
 0x220   : > { %1349 = vrot.lane.b32.xlu0 %v4090_v25, %s3518_s9  ;;  %v4162_v49 = vpop.f32.mrb[32].mxu1 }
 0x221   : > { %v4164_v51 = vpop.f32.mrb[33].mxu1 }
 0x222   : > { %4831 = vst [vmem:[#allocation48_spill] sm:$0xff] %v4164_v51  ;;  %1351 = vrot.lane.b32.xlu1 %v4096_v27, %s3518_s9  ;;  %v4168_v53 = vpop.f32.mrb[34].mxu1 }
 0x223   : > { %4832 = vst [vmem:[#allocation49_spill] sm:$0xff] %v4168_v53  ;;  %v4170_v56 = vpop.f32.mrb[35].mxu1 }
 0x224   : > { %4833 = vst [vmem:[#allocation50_spill] sm:$0xff] %v4170_v56  ;;  %1750 = vrot.lane.b32.xlu0 %v4092_v26, %s3518_s9 }
 0x226   : > { %1752 = vrot.lane.b32.xlu1 %v4098_v28, %s3518_s9 }
 0x228   : > { %1353 = vrot.lane.b32.xlu0 %v4106_v29, %s3518_s9  ;;  %v4180_v40 = vpop.f32.mrb[36].mxu1 }
 0x229   : > { %4834 = vst [vmem:[#allocation51_spill] sm:$0xff] %v4180_v40  ;;  %v4182_v44 = vpop.f32.mrb[37].mxu1 }
 0x22a   : > { %4835 = vst [vmem:[#allocation52_spill] sm:$0xff] %v4182_v44  ;;  %1355 = vrot.lane.b32.xlu1 %v4112_v31, %s3518_s9  ;;  %v4186_v47 = vpop.f32.mrb[38].mxu1 }
 0x22b   : > { %4836 = vst [vmem:[#allocation53_spill] sm:$0xff] %v4186_v47  ;;  %v4188_v52 = vpop.f32.mrb[39].mxu1 }
 0x22c   : > { %4837 = vst [vmem:[#allocation54_spill] sm:$0xff] %v4188_v52  ;;  %1754 = vrot.lane.b32.xlu0 %v4108_v30, %s3518_s9 }
 0x22e   : > { %1756 = vrot.lane.b32.xlu1 %v4114_v32, %s3518_s9 }
 0x230   : > { %1357 = vrot.lane.b32.xlu0 %v4122_v33, %s3518_s9  ;;  %v4198_v31 = vpop.f32.mrb[40].mxu1  ;;  %v1102_v33 = vpop.f32.mrb[32].mxu0 }
 0x231   : > { %4838 = vst [vmem:[#allocation55_spill] sm:$0xff] %v4198_v31  ;;  %v4200_v38 = vpop.f32.mrb[41].mxu1  ;;  %v1104_v32 = vpop.f32.mrb[33].mxu0 }
 0x232   : > { %4839 = vst [vmem:[#allocation56_spill] sm:$0xff] %v4200_v38  ;;  %1359 = vrot.lane.b32.xlu1 %v4128_v35, %s3518_s9  ;;  %v4204_v45 = vpop.f32.mrb[42].mxu1  ;;  %v1106_v54 = vpop.f32.mrb[34].mxu0 }
 0x233   : > { %4840 = vst [vmem:[#allocation57_spill] sm:$0xff] %v4204_v45  ;;  %v4206_v30 = vpop.f32.mrb[43].mxu1  ;;  %v1108_v37 = vpop.f32.mrb[35].mxu0  ;;  %v2780_v48 = vpack.c.bf16 %v1106_v54, %v1102_v33 }
 0x234   : > { %4841 = vst [vmem:[#allocation58_spill] sm:$0xff] %v4206_v30  ;;  %1758 = vrot.lane.b32.xlu0 %v4124_v34, %s3518_s9  ;;  %v2900_v50 = vpack.c.bf16 %v1108_v37, %v1104_v32 }
 0x235   : > { %2934 = vst [vmem:[%s4154_s7 + $0x20] sm:$0xff] %v2780_v48  }
 0x236   : > { %1760 = vrot.lane.b32.xlu1 %v4130_v36, %s3518_s9  ;;  %2958 = vst [vmem:[%s4154_s7 + $0x60] sm:$0xff] %v2900_v50  }
 0x238   : > { %1361 = vrot.lane.b32.xlu0 %v4138_v39, %s3518_s9  ;;  %v4216_v35 = vpop.f32.mrb[44].mxu1  ;;  %v1112_v39 = vpop.f32.mrb[36].mxu0 }
 0x239   : > { %4842 = vst [vmem:[#allocation59_spill] sm:$0xff] %v4216_v35  ;;  %v4218_v55 = vpop.f32.mrb[45].mxu1  ;;  %v1114_v34 = vpop.f32.mrb[37].mxu0 }
 0x23a   : > { %4843 = vst [vmem:[#allocation60_spill] sm:$0xff] %v4218_v55  ;;  %1363 = vrot.lane.b32.xlu1 %v4144_v43, %s3518_s9  ;;  %v4222_v42 = vpop.f32.mrb[46].mxu1  ;;  %v1116_v43 = vpop.f32.mrb[38].mxu0 }
 0x23b   : > { %4844 = vst [vmem:[#allocation61_spill] sm:$0xff] %v4222_v42  ;;  %v4224_v36 = vpop.f32.mrb[47].mxu1  ;;  %v1118_v33 = vpop.f32.mrb[39].mxu0  ;;  %v2785_v32 = vpack.c.bf16 %v1116_v43, %v1112_v39 }
 0x23c   : > { %4845 = vst [vmem:[#allocation62_spill] sm:$0xff] %v4224_v36  ;;  %1762 = vrot.lane.b32.xlu0 %v4140_v41, %s3518_s9  ;;  %v2905_v54 = vpack.c.bf16 %v1118_v33, %v1114_v34  ;;  %v1122_v37 = vpop.f32.mrb[40].mxu0 }
 0x23d   : > { %2935 = vst [vmem:[%s4154_s7 + $0x28] sm:$0xff] %v2785_v32   ;;  %v1124_v48 = vpop.f32.mrb[41].mxu0 }
 0x23e   : > { %1764 = vrot.lane.b32.xlu1 %v4149_v46, %s3518_s9  ;;  %2959 = vst [vmem:[%s4154_s7 + $0x68] sm:$0xff] %v2905_v54   ;;  %v1126_v50 = vpop.f32.mrb[42].mxu0 }
 0x23f   : > { %v2790_v34 = vpack.c.bf16 %v1126_v50, %v1122_v37  ;;  %v4260_v37 = vld [vmem:[%s4257_s1 + $0x48] sm:$0xff] }
 0x240   : > { %1365 = vrot.lane.b32.xlu0 %v4162_v49, %s3518_s9 }
 0x241   : > { %2936 = vst [vmem:[%s4154_s7 + $0x30] sm:$0xff] %v2790_v34   ;;  %v4263_v34 = vld [vmem:[%s3929_s2 + $0x40] sm:$0xff] }
 0x242   : > { %1367 = vrot.lane.b32.xlu1 %v4168_v53, %s3518_s9  ;;  %v1128_v53 = vpop.f32.mrb[43].mxu0 }
 0x243   : > { %v2910_v39 = vpack.c.bf16 %v1128_v53, %v1124_v48  ;;  %v1132_v43 = vpop.f32.mrb[44].mxu0 }
 0x244   : > { %1766 = vrot.lane.b32.xlu0 %v4164_v51, %s3518_s9  ;;  %v1134_v33 = vpop.f32.mrb[45].mxu0 }
 0x245   : > { %2960 = vst [vmem:[%s4154_s7 + $0x70] sm:$0xff] %v2910_v39   ;;  %v1136_v32 = vpop.f32.mrb[46].mxu0  ;;  %v4266_v39 = vld [vmem:[%s3929_s2 + $0x48] sm:$0xff] }
 0x246   : > { %1768 = vrot.lane.b32.xlu1 %v4170_v56, %s3518_s9  ;;  %v1138_v54 = vpop.f32.mrb[47].mxu0  ;;  %v2795_v48 = vpack.c.bf16 %v1136_v32, %v1132_v43  ;;  %v4279_v43 = vld [vmem:[%s4257_s1 + $0x8] sm:$0xff]  ;;  %v1182_v32 = vmul.f32 %v4266_v39, %v4004_v62 }
 0x247   : > { %v2915_v50 = vpack.c.bf16 %v1138_v54, %v1134_v33  ;;  %v1181_v33 = vmul.f32 %v4263_v34, %v3994_v58 }
 0x248   : > { %1369 = vrot.lane.b32.xlu0 %v4180_v40, %s3518_s9  ;;  %2937 = vst [vmem:[%s4154_s7 + $0x38] sm:$0xff] %v2795_v48   ;;  %v4290_v48 = vld [vmem:[%s3929_s2 + $0x8] sm:$0xff]  ;;  %v4296_v40 = vld [vmem:[%s4257_s1] sm:$0xff] }
 0x249   : > { %2961 = vst [vmem:[%s4154_s7 + $0x78] sm:$0xff] %v2915_v50  }
 0x24a   : > { %1371 = vrot.lane.b32.xlu1 %v4186_v47, %s3518_s9 }
 0x24c   : > { %1770 = vrot.lane.b32.xlu0 %v4182_v44, %s3518_s9 }
 0x24e   : > { %1772 = vrot.lane.b32.xlu1 %v4188_v52, %s3518_s9 }
 0x250   : > { %1373 = vrot.lane.b32.xlu0 %v4198_v31, %s3518_s9 }
 0x252   : > { %v1190_v53 = vpop.permute.xlu0 %1189  ;;  %1375 = vrot.lane.b32.xlu1 %v4204_v45, %s3518_s9  ;;  %v4271_v45 = vld [vmem:[%s4257_s1 + $0x40] sm:$0xff] }
 0x254   : > { %v1208_v31 = vpop.permute.xlu1 %1207  ;;  %1774 = vrot.lane.b32.xlu0 %v4200_v38, %s3518_s9  ;;  %v4287_v38 = vld [vmem:[%s3929_s2] sm:$0xff] }
 0x255   : > { %v1230_v52 = vmul.f32 %v1208_v31, %v4260_v37  ;;  %v1573_v62 = vmul.f32 %v4287_v38, %v4000_v60 }
 0x256   : > { %v1206_v44 = vpop.permute.xlu0 %1205  ;;  %1776 = vrot.lane.b32.xlu1 %v4206_v30, %s3518_s9 }
 0x257   : > { %v1229_v54 = vmul.f32 %v1206_v44, %v4271_v45  ;;  %v1246_v50 = vadd.f32 %v1230_v52, %v1182_v32  ;;  %v1574_v44 = vmul.f32 %v4290_v48, %v4008_v63 }
 0x258   : > { %v1592_v31 = vpop.permute.xlu1 %1591  ;;  %1377 = vrot.lane.b32.xlu0 %v4216_v35, %s3518_s9 }
 0x259   : > { %v1245_v30 = vadd.f32 %v1229_v54, %v1181_v33  ;;  %v1622_v47 = vmul.f32 %v1592_v31, %v4279_v43  ;;  %v1582_v54 = vmul.f32 %v4266_v39, %v4010_v0  ;;  %v4330_v0 = vld [vmem:[%s3929_s2 + $0x18] sm:$0xff] }
 0x25a   : > { %v1590_v58 = vpop.permute.xlu0 %1589  ;;  %1379 = vrot.lane.b32.xlu1 %v4222_v42, %s3518_s9 }
 0x25b   : > { %v2700_v56 = vpack.c.bf16 %v1246_v50, %v1245_v30  ;;  %v1621_v35 = vmul.f32 %v1590_v58, %v4296_v40  ;;  %v1638_v33 = vadd.f32 %v1622_v47, %v1574_v44  ;;  %v1581_v30 = vmul.f32 %v4263_v34, %v3996_v59  ;;  %v4323_v47 = vld [vmem:[%s3929_s2 + $0x10] sm:$0xff] }
 0x25c   : > { %v1608_v52 = vpop.permute.xlu1 %1607  ;;  %1778 = vrot.lane.b32.xlu0 %v4218_v55, %s3518_s9  ;;  %v1221_v58 = vmul.f32 %v1190_v53, %v4296_v40  ;;  %v1173_v59 = vmul.f32 %v4287_v38, %v3992_v57 }
 0x25d   : > { %2920 = vst [vmem:[%s4308_s3 + $0x20] sm:$0xff] %v2700_v56   ;;  %v1637_v32 = vadd.f32 %v1621_v35, %v1573_v62  ;;  %v1630_v60 = vmul.f32 %v1608_v52, %v4260_v37  ;;  %v4320_v56 = vld [vmem:[%s4257_s1 + $0x10] sm:$0xff] }
 0x25e   : > { %v1606_v63 = vpop.permute.xlu0 %1605  ;;  %1780 = vrot.lane.b32.xlu1 %v4224_v36, %s3518_s9 }
 0x25f   : > { %v2800_v31 = vpack.c.bf16 %v1638_v33, %v1637_v32  ;;  %v1629_v50 = vmul.f32 %v1606_v63, %v4271_v45  ;;  %v1646_v62 = vadd.f32 %v1630_v60, %v1582_v54  ;;  %v4333_v33 = vld [vmem:[%s4257_s1 + $0x18] sm:$0xff]  ;;  %v1174_v32 = vmul.f32 %v4290_v48, %v4002_v61  ;;  %v4342_v54 = vld [vmem:[%s4257_s1 + $0x50] sm:$0xff] }
 0x260   : > { %v1194_v35 = vpop.permute.xlu1 %1193 }
 0x261   : > { %2938 = vst [vmem:[%s4308_s3 + $0x40] sm:$0xff] %v2800_v31   ;;  %v1645_v44 = vadd.f32 %v1629_v50, %v1581_v30  ;;  %v1223_v53 = vmul.f32 %v1194_v35, %v4320_v56  ;;  %v1175_v30 = vmul.f32 %v4323_v47, %v4016_v1  ;;  %v1176_v31 = vmul.f32 %v4330_v0, %v4026_v5  ;;  %v4352_v35 = vld [vmem:[%s3929_s2 + $0x58] sm:$0xff] }
 0x262   : > { %v1192_v52 = vpop.permute.xlu0 %1191  ;;  %v1237_v50 = vadd.f32 %v1221_v58, %v1173_v59  ;;  %v1184_v59 = vmul.f32 %v4352_v35, %v4028_v6  ;;  %v1576_v6 = vmul.f32 %v4330_v0, %v4032_v7  ;;  %v1584_v7 = vmul.f32 %v4352_v35, %v4034_v8 }
 0x263   : > { %v2820_v63 = vpack.c.bf16 %v1646_v62, %v1645_v44  ;;  %v1222_v60 = vmul.f32 %v1192_v52, %v4279_v43  ;;  %v4349_v62 = vld [vmem:[%s3929_s2 + $0x50] sm:$0xff]  ;;  %v4355_v52 = vld [vmem:[%s4257_s1 + $0x58] sm:$0xff]  ;;  %v1239_v1 = vadd.f32 %v1223_v53, %v1175_v30 }
 0x264   : > { %v1196_v57 = vpop.permute.xlu1 %1195  ;;  %v1183_v58 = vmul.f32 %v4349_v62, %v4018_v2  ;;  %v1575_v2 = vmul.f32 %v4323_v47, %v4022_v3  ;;  %v1583_v3 = vmul.f32 %v4349_v62, %v4024_v4 }
 0x265   : > { %2942 = vst [vmem:[%s4308_s3 + $0x60] sm:$0xff] %v2820_v63   ;;  %v1238_v36 = vadd.f32 %v1222_v60, %v1174_v32  ;;  %v1224_v61 = vmul.f32 %v1196_v57, %v4333_v33 }
 0x266   : > { %v1210_v44 = vpop.permute.xlu0 %1209 }
 0x267   : > { %v2680_v55 = vpack.c.bf16 %v1238_v36, %v1237_v50  ;;  %v1240_v42 = vadd.f32 %v1224_v61, %v1176_v31  ;;  %v1231_v51 = vmul.f32 %v1210_v44, %v4342_v54 }
 0x268   : > { %v1212_v5 = vpop.permute.xlu1 %1211 }
 0x269   : > { %2681 = vst [vmem:[%s4308_s3] sm:$0xff] %v2680_v55   ;;  %v2685_v32 = vpack.c.bf16 %v1240_v42, %v1239_v1  ;;  %v1232_v63 = vmul.f32 %v1212_v5, %v4355_v52  ;;  %v1247_v53 = vadd.f32 %v1231_v51, %v1183_v58  ;;  %v4374_v1 = vld [vmem:[%s4257_s1 + $0x20] sm:$0xff] }
 0x26a   : > { %v1594_v60 = vpop.permute.xlu0 %1593 }
 0x26b   : > { %2917 = vst [vmem:[%s4308_s3 + $0x8] sm:$0xff] %v2685_v32   ;;  %v1248_v36 = vadd.f32 %v1232_v63, %v1184_v59  ;;  %v1623_v30 = vmul.f32 %v1594_v60, %v4320_v56  ;;  %v4382_v59 = vld [vmem:[%s3929_s2 + $0x20] sm:$0xff]  ;;  %v4385_v32 = vld [vmem:[%s3929_s2 + $0x28] sm:$0xff] }
 0x26c   : > { %v1596_v57 = vpop.permute.xlu1 %1595  ;;  %v4388_v60 = vld [vmem:[%s4257_s1 + $0x28] sm:$0xff] }
 0x26d   : > { %v2705_v55 = vpack.c.bf16 %v1248_v36, %v1247_v53  ;;  %v1624_v42 = vmul.f32 %v1596_v57, %v4333_v33  ;;  %v1639_v51 = vadd.f32 %v1623_v30, %v1575_v2  ;;  %v4393_v30 = vld [vmem:[%s4257_s1 + $0x60] sm:$0xff]  ;;  %v1177_v57 = vmul.f32 %v4382_v59, %v4040_v9 }
 0x26e   : > { %v1610_v31 = vpop.permute.xlu0 %1609  ;;  %v1178_v2 = vmul.f32 %v4385_v32, %v4050_v13 }
 0x26f   : > { %2921 = vst [vmem:[%s4308_s3 + $0x28] sm:$0xff] %v2705_v55   ;;  %v1640_v50 = vadd.f32 %v1624_v42, %v1576_v6  ;;  %v1631_v61 = vmul.f32 %v1610_v31, %v4342_v54  ;;  %v4401_v42 = vld [vmem:[%s3929_s2 + $0x60] sm:$0xff]  ;;  %v4404_v31 = vld [vmem:[%s3929_s2 + $0x68] sm:$0xff] }
 0x270   : > { %v1612_v44 = vpop.permute.xlu1 %1611  ;;  %v1185_v13 = vmul.f32 %v4401_v42, %v4042_v10  ;;  %v1578_v10 = vmul.f32 %v4385_v32, %v4056_v15  ;;  %v1586_v15 = vmul.f32 %v4404_v31, %v4058_v16 }
 0x271   : > { %v2805_v5 = vpack.c.bf16 %v1640_v50, %v1639_v51  ;;  %v1632_v58 = vmul.f32 %v1612_v44, %v4355_v52  ;;  %v1647_v53 = vadd.f32 %v1631_v61, %v1583_v3  ;;  %v4407_v50 = vld [vmem:[%s4257_s1 + $0x68] sm:$0xff] }
 0x272   : > { %v1198_v63 = vpop.permute.xlu0 %1197 }
 0x273   : > { %2939 = vst [vmem:[%s4308_s3 + $0x48] sm:$0xff] %v2805_v5   ;;  %v1648_v4 = vadd.f32 %v1632_v58, %v1584_v7  ;;  %v1225_v36 = vmul.f32 %v1198_v63, %v4374_v1  ;;  %v1186_v7 = vmul.f32 %v4404_v31, %v4052_v14 }
 0x274   : > { %v1200_v8 = vpop.permute.xlu1 %1199 }
 0x275   : > { %v2825_v6 = vpack.c.bf16 %v1648_v4, %v1647_v53  ;;  %v1226_v55 = vmul.f32 %v1200_v8, %v4388_v60  ;;  %v1241_v61 = vadd.f32 %v1225_v36, %v1177_v57  ;;  %v1577_v57 = vmul.f32 %v4382_v59, %v4046_v11 }
 0x276   : > { %v1214_v51 = vpop.permute.xlu0 %1213  ;;  %v1585_v11 = vmul.f32 %v4401_v42, %v4048_v12 }
 0x277   : > { %2943 = vst [vmem:[%s4308_s3 + $0x68] sm:$0xff] %v2825_v6   ;;  %v1242_v44 = vadd.f32 %v1226_v55, %v1178_v2  ;;  %v1233_v3 = vmul.f32 %v1214_v51, %v4393_v30 }
 0x278   : > { %v1216_v9 = vpop.permute.xlu1 %1215 }
 0x279   : > { %v2690_v5 = vpack.c.bf16 %v1242_v44, %v1241_v61  ;;  %v1234_v58 = vmul.f32 %v1216_v9, %v4407_v50  ;;  %v1249_v53 = vadd.f32 %v1233_v3, %v1185_v13  ;;  %v4426_v3 = vld [vmem:[%s4257_s1 + $0x30] sm:$0xff] }
 0x27a   : > { %v1598_v63 = vpop.permute.xlu0 %1597 }
 0x27b   : > { %2918 = vst [vmem:[%s4308_s3 + $0x10] sm:$0xff] %v2690_v5   ;;  %v1250_v4 = vadd.f32 %v1234_v58, %v1186_v7  ;;  %v1625_v36 = vmul.f32 %v1598_v63, %v4374_v1  ;;  %v4434_v7 = vld [vmem:[%s3929_s2 + $0x30] sm:$0xff]  ;;  %v4437_v5 = vld [vmem:[%s3929_s2 + $0x38] sm:$0xff] }
 0x27c   : > { %v1600_v8 = vpop.permute.xlu1 %1599  ;;  %v4440_v63 = vld [vmem:[%s4257_s1 + $0x38] sm:$0xff] }
 0x27d   : > { %v2710_v14 = vpack.c.bf16 %v1250_v4, %v1249_v53  ;;  %v1626_v2 = vmul.f32 %v1600_v8, %v4388_v60  ;;  %v1641_v55 = vadd.f32 %v1625_v36, %v1577_v57  ;;  %v4445_v36 = vld [vmem:[%s4257_s1 + $0x70] sm:$0xff]  ;;  %v1179_v8 = vmul.f32 %v4434_v7, %v4064_v17 }
 0x27e   : > { %v1614_v6 = vpop.permute.xlu0 %1613  ;;  %v1180_v57 = vmul.f32 %v4437_v5, %v4074_v21 }
 0x27f   : > { %2922 = vst [vmem:[%s4308_s3 + $0x30] sm:$0xff] %v2710_v14   ;;  %v1642_v51 = vadd.f32 %v1626_v2, %v1578_v10  ;;  %v1633_v61 = vmul.f32 %v1614_v6, %v4393_v30  ;;  %v4453_v2 = vld [vmem:[%s3929_s2 + $0x70] sm:$0xff]  ;;  %v4456_v6 = vld [vmem:[%s3929_s2 + $0x78] sm:$0xff] }
 0x280   : > { %v1616_v44 = vpop.permute.xlu1 %1615  ;;  %v1187_v21 = vmul.f32 %v4453_v2, %v4066_v18  ;;  %v1580_v18 = vmul.f32 %v4437_v5, %v4080_v23 }
 0x281   : > { %v2810_v9 = vpack.c.bf16 %v1642_v51, %v1641_v55  ;;  %v1634_v13 = vmul.f32 %v1616_v44, %v4407_v50  ;;  %v1649_v53 = vadd.f32 %v1633_v61, %v1585_v11  ;;  %v4459_v51 = vld [vmem:[%s4257_s1 + $0x78] sm:$0xff] }
 0x282   : > { %v1202_v58 = vpop.permute.xlu0 %1201 }
 0x283   : > { %2940 = vst [vmem:[%s4308_s3 + $0x50] sm:$0xff] %v2810_v9   ;;  %v1650_v12 = vadd.f32 %v1634_v13, %v1586_v15  ;;  %v1227_v4 = vmul.f32 %v1202_v58, %v4426_v3  ;;  %v1188_v15 = vmul.f32 %v4456_v6, %v4076_v22 }
 0x284   : > { %v1204_v16 = vpop.permute.xlu1 %1203 }
 0x285   : > { %v2830_v10 = vpack.c.bf16 %v1650_v12, %v1649_v53  ;;  %v1228_v14 = vmul.f32 %v1204_v16, %v4440_v63  ;;  %v1243_v61 = vadd.f32 %v1227_v4, %v1179_v8  ;;  %v1579_v8 = vmul.f32 %v4434_v7, %v4070_v19 }
 0x286   : > { %v1218_v55 = vpop.permute.xlu0 %1217  ;;  %v1588_v19 = vmul.f32 %v4456_v6, %v4082_v24 }
 0x287   : > { %2944 = vst [vmem:[%s4308_s3 + $0x70] sm:$0xff] %v2830_v10   ;;  %v1244_v44 = vadd.f32 %v1228_v14, %v1180_v57  ;;  %v1235_v11 = vmul.f32 %v1218_v55, %v4445_v36 }
 0x288   : > { %v1220_v17 = vpop.permute.xlu1 %1219 }
 0x289   : > { %v2695_v9 = vpack.c.bf16 %v1244_v44, %v1243_v61  ;;  %v1236_v13 = vmul.f32 %v1220_v17, %v4459_v51  ;;  %v1251_v53 = vadd.f32 %v1235_v11, %v1187_v21  ;;  %v1587_v11 = vmul.f32 %v4453_v2, %v4072_v20 }
 0x28a   : > { %v1602_v58 = vpop.permute.xlu0 %1601  ;;  %v1334_v20 = vmul.f32 %v4290_v48, %v4096_v27 }
 0x28b   : > { %2919 = vst [vmem:[%s4308_s3 + $0x18] sm:$0xff] %v2695_v9   ;;  %v1252_v12 = vadd.f32 %v1236_v13, %v1188_v15  ;;  %v1627_v4 = vmul.f32 %v1602_v58, %v4426_v3 }
 0x28c   : > { %v1604_v16 = vpop.permute.xlu1 %1603 }
 0x28d   : > { %v2715_v57 = vpack.c.bf16 %v1252_v12, %v1251_v53  ;;  %v1628_v22 = vmul.f32 %v1604_v16, %v4440_v63  ;;  %v1643_v14 = vadd.f32 %v1627_v4, %v1579_v8  ;;  %v1333_v53 = vmul.f32 %v4287_v38, %v4090_v25 }
 0x28e   : > { %v1618_v10 = vpop.permute.xlu0 %1617 }
 0x28f   : > { %2923 = vst [vmem:[%s4308_s3 + $0x38] sm:$0xff] %v2715_v57   ;;  %v1644_v55 = vadd.f32 %v1628_v22, %v1580_v18  ;;  %v1635_v61 = vmul.f32 %v1618_v10, %v4445_v36  ;;  %v1734_v22 = vmul.f32 %v4287_v38, %v4092_v26  ;;  %v1735_v10 = vmul.f32 %v4290_v48, %v4098_v28  ;;  %v4846_v38 = vld [vmem:[#allocation40_spill] sm:$0xff] }
 0x290   : > { %v1620_v44 = vpop.permute.xlu1 %1619  ;;  %v1335_v26 = vmul.f32 %v4323_v47, %v4106_v29  ;;  %v1336_v28 = vmul.f32 %v4330_v0, %v4846_v38 }
 0x291   : > { %v2815_v17 = vpack.c.bf16 %v1644_v55, %v1643_v14  ;;  %v1636_v23 = vmul.f32 %v1620_v44, %v4459_v51  ;;  %v1651_v15 = vadd.f32 %v1635_v61, %v1587_v11 }
 0x292   : > { %v1350_v21 = vpop.permute.xlu0 %1349 }
 0x293   : > { %2941 = vst [vmem:[%s4308_s3 + $0x58] sm:$0xff] %v2815_v17   ;;  %v1652_v9 = vadd.f32 %v1636_v23, %v1588_v19  ;;  %v1381_v13 = vmul.f32 %v1350_v21, %v4296_v40 }
 0x294   : > { %v1352_v58 = vpop.permute.xlu1 %1351 }
 0x295   : > { %v2835_v12 = vpack.c.bf16 %v1652_v9, %v1651_v15  ;;  %v1382_v24 = vmul.f32 %v1352_v58, %v4279_v43  ;;  %v1397_v16 = vadd.f32 %v1381_v13, %v1333_v53  ;;  %v4847_v15 = vld [vmem:[#allocation39_spill] sm:$0xff]  ;;  %v4848_v13 = vld [vmem:[#allocation41_spill] sm:$0xff] }
 0x296   : > { %v1751_v4 = vpop.permute.xlu0 %1750  ;;  %v1736_v9 = vmul.f32 %v4323_v47, %v4847_v15  ;;  %v1737_v29 = vmul.f32 %v4330_v0, %v4848_v13 }
 0x297   : > { %2945 = vst [vmem:[%s4308_s3 + $0x78] sm:$0xff] %v2835_v12   ;;  %v1398_v8 = vadd.f32 %v1382_v24, %v1334_v20  ;;  %v1782_v18 = vmul.f32 %v1751_v4, %v4296_v40 }
 0x298   : > { %v1753_v57 = vpop.permute.xlu1 %1752 }
 0x299   : > { %v2720_v25 = vpack.c.bf16 %v1398_v8, %v1397_v16  ;;  %v1783_v14 = vmul.f32 %v1753_v57, %v4279_v43  ;;  %v1798_v55 = vadd.f32 %v1782_v18, %v1734_v22  ;;  %v4849_v8 = vld [vmem:[#allocation42_spill] sm:$0xff]  ;;  %v4850_v18 = vld [vmem:[#allocation44_spill] sm:$0xff] }
 0x29a   : > { %v1354_v27 = vpop.permute.xlu0 %1353  ;;  %v1338_v47 = vmul.f32 %v4385_v32, %v4850_v18 }
 0x29b   : > { %2721 = vst [vmem:[%s4497_s17] sm:$0xff] %v2720_v25   ;;  %v1799_v61 = vadd.f32 %v1783_v14, %v1735_v10  ;;  %v1383_v40 = vmul.f32 %v1354_v27, %v4320_v56  ;;  %v4851_v27 = vld [vmem:[#allocation43_spill] sm:$0xff] }
 0x29c   : > { %v1356_v44 = vpop.permute.xlu1 %1355 }
 0x29d   : > { %v2840_v48 = vpack.c.bf16 %v1799_v61, %v1798_v55  ;;  %v1384_v43 = vmul.f32 %v1356_v44, %v4333_v33  ;;  %v1399_v19 = vadd.f32 %v1383_v40, %v1335_v26  ;;  %v1738_v55 = vmul.f32 %v4382_v59, %v4851_v27  ;;  %v4852_v61 = vld [vmem:[#allocation45_spill] sm:$0xff] }
 0x29e   : > { %v1755_v11 = vpop.permute.xlu0 %1754  ;;  %v1739_v40 = vmul.f32 %v4385_v32, %v4852_v61 }
 0x29f   : > { %2946 = vst [vmem:[%s4497_s17 + $0x40] sm:$0xff] %v2840_v48   ;;  %v1400_v17 = vadd.f32 %v1384_v43, %v1336_v28  ;;  %v1784_v23 = vmul.f32 %v1755_v11, %v4320_v56  ;;  %v1337_v56 = vmul.f32 %v4382_v59, %v4849_v8 }
 0x2a0   : > { %v1757_v21 = vpop.permute.xlu1 %1756 }
 0x2a1   : > { %v2725_v58 = vpack.c.bf16 %v1400_v17, %v1399_v19  ;;  %v1785_v53 = vmul.f32 %v1757_v21, %v4333_v33  ;;  %v1800_v12 = vadd.f32 %v1784_v23, %v1736_v9  ;;  %v4853_v19 = vld [vmem:[#allocation46_spill] sm:$0xff]  ;;  %v4854_v17 = vld [vmem:[#allocation47_spill] sm:$0xff] }
 0x2a2   : > { %v1358_v20 = vpop.permute.xlu0 %1357  ;;  %v1340_v59 = vmul.f32 %v4437_v5, %v4854_v17  ;;  %v4861_v17 = vld [vmem:[#allocation54_spill] sm:$0xff] }
 0x2a3   : > { %2924 = vst [vmem:[%s4497_s17 + $0x8] sm:$0xff] %v2725_v58   ;;  %v1801_v24 = vadd.f32 %v1785_v53, %v1737_v29  ;;  %v1385_v4 = vmul.f32 %v1358_v20, %v4374_v1  ;;  %v1740_v29 = vmul.f32 %v4434_v7, %v4140_v41  ;;  %v1741_v58 = vmul.f32 %v4437_v5, %v4149_v46 }
 0x2a4   : > { %v1360_v16 = vpop.permute.xlu1 %1359 }
 0x2a5   : > { %v2845_v57 = vpack.c.bf16 %v1801_v24, %v1800_v12  ;;  %v1386_v0 = vmul.f32 %v1360_v16, %v4388_v60  ;;  %v1401_v33 = vadd.f32 %v1385_v4, %v1337_v56  ;;  %v4855_v56 = vld [vmem:[#allocation49_spill] sm:$0xff] }
 0x2a6   : > { %v1759_v22 = vpop.permute.xlu0 %1758  ;;  %v1342_v41 = vmul.f32 %v4266_v39, %v4855_v56 }
 0x2a7   : > { %2947 = vst [vmem:[%s4497_s17 + $0x48] sm:$0xff] %v2845_v57   ;;  %v1402_v10 = vadd.f32 %v1386_v0, %v1338_v47  ;;  %v1786_v25 = vmul.f32 %v1759_v22, %v4374_v1  ;;  %v1339_v1 = vmul.f32 %v4434_v7, %v4853_v19  ;;  %v4856_v0 = vld [vmem:[#allocation48_spill] sm:$0xff] }
 0x2a8   : > { %v1761_v14 = vpop.permute.xlu1 %1760  ;;  %v1742_v22 = vmul.f32 %v4263_v34, %v4856_v0  ;;  %v4860_v19 = vld [vmem:[#allocation52_spill] sm:$0xff]  ;;  %v4867_v0 = vld [vmem:[#allocation61_spill] sm:$0xff] }
 0x2a9   : > { %v2730_v44 = vpack.c.bf16 %v1402_v10, %v1401_v33  ;;  %v1787_v26 = vmul.f32 %v1761_v14, %v4388_v60  ;;  %v1802_v28 = vadd.f32 %v1786_v25, %v1738_v55  ;;  %v4857_v33 = vld [vmem:[#allocation50_spill] sm:$0xff] }
 0x2aa   : > { %v1362_v38 = vpop.permute.xlu0 %1361 }
 0x2ab   : > { %2925 = vst [vmem:[%s4497_s17 + $0x10] sm:$0xff] %v2730_v44   ;;  %v1803_v48 = vadd.f32 %v1787_v26, %v1739_v40  ;;  %v1387_v43 = vmul.f32 %v1362_v38, %v4426_v3  ;;  %v4858_v44 = vld [vmem:[#allocation51_spill] sm:$0xff]  ;;  %v4859_v26 = vld [vmem:[#allocation53_spill] sm:$0xff] }
 0x2ac   : > { %v1364_v11 = vpop.permute.xlu1 %1363 }
 0x2ad   : > { %v2850_v23 = vpack.c.bf16 %v1803_v48, %v1802_v28  ;;  %v1388_v32 = vmul.f32 %v1364_v11, %v4440_v63  ;;  %v1403_v60 = vadd.f32 %v1387_v43, %v1339_v1  ;;  %v1744_v1 = vmul.f32 %v4349_v62, %v4860_v19 }
 0x2ae   : > { %v1763_v21 = vpop.permute.xlu0 %1762 }
 0x2af   : > { %2948 = vst [vmem:[%s4497_s17 + $0x50] sm:$0xff] %v2850_v23   ;;  %v1404_v15 = vadd.f32 %v1388_v32, %v1340_v59  ;;  %v1788_v9 = vmul.f32 %v1763_v21, %v4426_v3  ;;  %v1341_v3 = vmul.f32 %v4263_v34, %v4162_v49  ;;  %v1743_v49 = vmul.f32 %v4266_v39, %v4857_v33 }
 0x2b0   : > { %v1765_v13 = vpop.permute.xlu1 %1764  ;;  %v1344_v34 = vmul.f32 %v4352_v35, %v4859_v26  ;;  %v1745_v59 = vmul.f32 %v4352_v35, %v4861_v17 }
 0x2b1   : > { %v2735_v53 = vpack.c.bf16 %v1404_v15, %v1403_v60  ;;  %v1789_v20 = vmul.f32 %v1765_v13, %v4440_v63  ;;  %v1804_v24 = vadd.f32 %v1788_v9, %v1740_v29  ;;  %v4862_v29 = vld [vmem:[#allocation55_spill] sm:$0xff] }
 0x2b2   : > { %v1366_v12 = vpop.permute.xlu0 %1365 }
 0x2b3   : > { %2926 = vst [vmem:[%s4497_s17 + $0x18] sm:$0xff] %v2735_v53   ;;  %v1805_v4 = vadd.f32 %v1789_v20, %v1741_v58  ;;  %v1389_v16 = vmul.f32 %v1366_v12, %v4271_v45  ;;  %v4863_v58 = vld [vmem:[#allocation57_spill] sm:$0xff] }
 0x2b4   : > { %v1368_v8 = vpop.permute.xlu1 %1367 }
 0x2b5   : > { %v2855_v7 = vpack.c.bf16 %v1805_v4, %v1804_v24  ;;  %v1390_v46 = vmul.f32 %v1368_v8, %v4260_v37  ;;  %v1405_v63 = vadd.f32 %v1389_v16, %v1341_v3  ;;  %v4864_v16 = vld [vmem:[#allocation56_spill] sm:$0xff]  ;;  %v4865_v3 = vld [vmem:[#allocation58_spill] sm:$0xff] }
 0x2b6   : > { %v1767_v5 = vpop.permute.xlu0 %1766  ;;  %v1746_v8 = vmul.f32 %v4401_v42, %v4864_v16  ;;  %v1747_v56 = vmul.f32 %v4404_v31, %v4865_v3 }
 0x2b7   : > { %2949 = vst [vmem:[%s4497_s17 + $0x58] sm:$0xff] %v2855_v7   ;;  %v1406_v18 = vadd.f32 %v1390_v46, %v1342_v41  ;;  %v1790_v47 = vmul.f32 %v1767_v5, %v4271_v45  ;;  %v1343_v45 = vmul.f32 %v4349_v62, %v4858_v44  ;;  %v1346_v62 = vmul.f32 %v4404_v31, %v4863_v58 }
 0x2b8   : > { %v1769_v57 = vpop.permute.xlu1 %1768 }
 0x2b9   : > { %v2740_v10 = vpack.c.bf16 %v1406_v18, %v1405_v63  ;;  %v1791_v25 = vmul.f32 %v1769_v57, %v4260_v37  ;;  %v1806_v27 = vadd.f32 %v1790_v47, %v1742_v22 }
 0x2ba   : > { %v1370_v14 = vpop.permute.xlu0 %1369 }
 0x2bb   : > { %2927 = vst [vmem:[%s4497_s17 + $0x20] sm:$0xff] %v2740_v10   ;;  %v1807_v55 = vadd.f32 %v1791_v25, %v1743_v49  ;;  %v1391_v61 = vmul.f32 %v1370_v14, %v4342_v54  ;;  %v4868_v14 = vld [vmem:[#allocation60_spill] sm:$0xff] }
 0x2bc   : > { %v1372_v40 = vpop.permute.xlu1 %1371 }
 0x2bd   : > { %v2860_v38 = vpack.c.bf16 %v1807_v55, %v1806_v27  ;;  %v1392_v39 = vmul.f32 %v1372_v40, %v4355_v52  ;;  %v1407_v37 = vadd.f32 %v1391_v61, %v1343_v45  ;;  %v1748_v27 = vmul.f32 %v4453_v2, %v4868_v14  ;;  %v4869_v55 = vld [vmem:[#allocation62_spill] sm:$0xff] }
 0x2be   : > { %v1771_v28 = vpop.permute.xlu0 %1770  ;;  %v1749_v61 = vmul.f32 %v4456_v6, %v4869_v55 }
 0x2bf   : > { %2950 = vst [vmem:[%s4497_s17 + $0x60] sm:$0xff] %v2860_v38   ;;  %v1408_v48 = vadd.f32 %v1392_v39, %v1344_v34  ;;  %v1792_v43 = vmul.f32 %v1771_v28, %v4342_v54  ;;  %v1345_v54 = vmul.f32 %v4401_v42, %v4862_v29  ;;  %v1348_v42 = vmul.f32 %v4456_v6, %v4867_v0 }
 0x2c0   : > { %v1773_v11 = vpop.permute.xlu1 %1772 }
 0x2c1   : > { %v2745_v23 = vpack.c.bf16 %v1408_v48, %v1407_v37  ;;  %v1793_v32 = vmul.f32 %v1773_v11, %v4355_v52  ;;  %v1808_v60 = vadd.f32 %v1792_v43, %v1744_v1 }
 0x2c2   : > { %v1374_v21 = vpop.permute.xlu0 %1373 }
 0x2c3   : > { %2928 = vst [vmem:[%s4497_s17 + $0x28] sm:$0xff] %v2745_v23   ;;  %v1809_v15 = vadd.f32 %v1793_v32, %v1745_v59  ;;  %v1393_v9 = vmul.f32 %v1374_v21, %v4393_v30 }
 0x2c4   : > { %v1376_v13 = vpop.permute.xlu1 %1375 }
 0x2c5   : > { %v2865_v53 = vpack.c.bf16 %v1809_v15, %v1808_v60  ;;  %v1394_v35 = vmul.f32 %v1376_v13, %v4407_v50  ;;  %v1409_v52 = vadd.f32 %v1393_v9, %v1345_v54 }
 0x2c6   : > { %v1775_v20 = vpop.permute.xlu0 %1774 }
 0x2c7   : > { %2951 = vst [vmem:[%s4497_s17 + $0x68] sm:$0xff] %v2865_v53   ;;  %v1410_v12 = vadd.f32 %v1394_v35, %v1346_v62  ;;  %v1794_v24 = vmul.f32 %v1775_v20, %v4393_v30  ;;  %v4866_v30 = vld [vmem:[#allocation59_spill] sm:$0xff] }
 0x2c8   : > { %v1777_v4 = vpop.permute.xlu1 %1776  ;;  %v1347_v57 = vmul.f32 %v4453_v2, %v4866_v30 }
 0x2c9   : > { %v2750_v41 = vpack.c.bf16 %v1410_v12, %v1409_v52  ;;  %v1795_v7 = vmul.f32 %v1777_v4, %v4407_v50  ;;  %v1810_v5 = vadd.f32 %v1794_v24, %v1746_v8 }
 0x2ca   : > { %v1378_v46 = vpop.permute.xlu0 %1377 }
 0x2cb   : > { %2929 = vst [vmem:[%s4497_s17 + $0x30] sm:$0xff] %v2750_v41   ;;  %v1811_v63 = vadd.f32 %v1795_v7, %v1747_v56  ;;  %v1395_v18 = vmul.f32 %v1378_v46, %v4445_v36 }
 0x2cc   : > { %v1380_v47 = vpop.permute.xlu1 %1379 }
 0x2cd   : > { %v2870_v22 = vpack.c.bf16 %v1811_v63, %v1810_v5  ;;  %v1396_v31 = vmul.f32 %v1380_v47, %v4459_v51  ;;  %v1411_v33 = vadd.f32 %v1395_v18, %v1347_v57 }
 0x2ce   : > { %v1779_v50 = vpop.permute.xlu0 %1778 }
 0x2cf   : > { %2952 = vst [vmem:[%s4497_s17 + $0x70] sm:$0xff] %v2870_v22   ;;  %v1412_v49 = vadd.f32 %v1396_v31, %v1348_v42  ;;  %v1796_v10 = vmul.f32 %v1779_v50, %v4445_v36 }
 0x2d0   : > { %v1781_v25 = vpop.permute.xlu1 %1780 }
 0x2d1   : > { %v2755_v40 = vpack.c.bf16 %v1412_v49, %v1411_v33  ;;  %v1797_v44 = vmul.f32 %v1781_v25, %v4459_v51  ;;  %v1812_v45 = vadd.f32 %v1796_v10, %v1748_v27 }
 0x2d3   : > { %2930 = vst [vmem:[%s4497_s17 + $0x38] sm:$0xff] %v2755_v40   ;;  %v1813_v26 = vadd.f32 %v1797_v44, %v1749_v61 }
 0x2d5   : > { %v2875_v34 = vpack.c.bf16 %v1813_v26, %v1812_v45 }
 0x2d7   : > { %2953 = vst [vmem:[%s4497_s17 + $0x78] sm:$0xff] %v2875_v34  }
 0x2d8   : > { %s4870_s23 = sld [smem:[#allocation29_spill]]  ;;  %s4871_s6 = sld [smem:[#allocation30_spill]] }
 0x2d9   : > { %s2018_s27 = sshll.u32 %s4308_s3, 4  ;;  %s3519_s12 = smov 1024   ;;  %s2019_s27 = int_to_ptr.vmem [resolvable:$true] %s2018_s27 }
 0x2da   : > { %2996 = sst [smem:[#allocation16]] (%p3821_p10), %s3519_s12  ;;  %s4872_s19 = sld [smem:[#allocation66_spill]] }
 0x2db   : > { %s3520_s15 = smov 3072   ;;  %s3521_s2 = smov 16  }
 0x2dc   : > { %2997 = sst [smem:[#allocation16 + $0x1]] (%p3821_p10), %s3520_s15  ;;  %s3522_s9 = smov 64  }
 0x2dd   : > { %2998 = sst [smem:[#allocation16 + $0x2]] (%p3821_p10), %s3521_s2  ;;  %s3523_s22 = smov 4  }
 0x2de   : > { %s2571_s25 = sshll.u32 %s4870_s23, 4  ;;  %s2979_s30 = smul.u32 96, %s4871_s6 }
 0x2df   : > { %2999 = sst [smem:[#allocation16 + $0x3]] (%p3821_p10), %s3522_s9  ;;  %s3524_s1 = smov [#allocation15]  }
 0x2e0   : > { %s1999_s16 = sadd.s32 %s2979_s30, %s2571_s25  ;;  %3000 = sst [smem:[#allocation16 + $0x4]] (%p3821_p10), %s3522_s9 }
 0x2e1   : > { %s4607_s26 = sshll.u32 %s1999_s16, 6  ;;  %3001 = sst [smem:[#allocation16 + $0x5]] (%p3821_p10), %s3523_s22 }
 0x2e2   : > { %s2001_s5 = scalar_lea.hbm %s4872_s19, %s4607_s26  ;;  %s3525_s3 = smov 0  }
 0x2e3   : > { %3002 = dma.general (%p3821_p10), %s2019_s27, 2048, %s2001_s5, %s1977_s24, %s3524_s1, [#allocation16], %s3525_s3, 0  }
 0x2e4   : > { %s4873_s25 = sld [smem:[#allocation67_spill]]  ;;  %s2065_s16 = sshll.u32 %s4497_s17, 4  ;;  %s2066_s16 = int_to_ptr.vmem [resolvable:$true] %s2065_s16 }
 0x2e5   : > { %s3526_s12 = smov 1024   ;;  %s3527_s24 = smov 3072  }
 0x2e6   : > { %3003 = sst [smem:[#allocation18]] (%p3821_p10), %s3526_s12  ;;  %s3528_s27 = smov 16  }
 0x2e7   : > { %3004 = sst [smem:[#allocation18 + $0x1]] (%p3821_p10), %s3527_s24  ;;  %s3529_s13 = smov 64  }
 0x2e8   : > { %3005 = sst [smem:[#allocation18 + $0x2]] (%p3821_p10), %s3528_s27  ;;  %s3530_s8 = smov 4  }
 0x2e9   : > { %3006 = sst [smem:[#allocation18 + $0x3]] (%p3821_p10), %s3529_s13  ;;  %s3531_s19 = smov [#allocation17]  }
 0x2ea   : > { %s2048_s30 = scalar_lea.hbm %s4873_s25, %s4607_s26  ;;  %3007 = sst [smem:[#allocation18 + $0x4]] (%p3821_p10), %s3529_s13 }
 0x2eb   : > { %3008 = sst [smem:[#allocation18 + $0x5]] (%p3821_p10), %s3530_s8  ;;  %s3532_s17 = smov 0  }
 0x2ec   : > { %3009 = dma.general (%p3821_p10), %s2066_s16, 2048, %s2048_s30, %s4602_s18, %s3531_s19, [#allocation18], %s3532_s17, 0  }
 0x2ed   : > { %s4874_s2 = sld [smem:[#allocation68_spill]]  ;;  %s2112_s22 = sshll.u32 %s4154_s7, 4  ;;  %s2113_s22 = int_to_ptr.vmem [resolvable:$true] %s2112_s22 }
 0x2ee   : > { %s3533_s1 = smov 1024   ;;  %s3534_s3 = smov 3072  }
 0x2ef   : > { %3010 = sst [smem:[#allocation20]] (%p3821_p10), %s3533_s1  ;;  %s3535_s23 = smov 16  }
 0x2f0   : > { %3011 = sst [smem:[#allocation20 + $0x1]] (%p3821_p10), %s3534_s3  ;;  %s3536_s6 = smov 64  }
 0x2f1   : > { %3012 = sst [smem:[#allocation20 + $0x2]] (%p3821_p10), %s3535_s23  ;;  %s3537_s25 = smov 4  }
 0x2f2   : > { %3013 = sst [smem:[#allocation20 + $0x3]] (%p3821_p10), %s3536_s6  ;;  %s3539_s7 = smov 0  }
 0x2f3   : > { %s2095_s9 = scalar_lea.hbm %s4874_s2, %s4607_s26  ;;  %3014 = sst [smem:[#allocation20 + $0x4]] (%p3821_p10), %s3536_s6 }
 0x2f4   : > { %3015 = sst [smem:[#allocation20 + $0x5]] (%p3821_p10), %s3537_s25  ;;  %s3538_s26 = smov [#allocation19]  }
 0x2f5   : > { %3016 = dma.general (%p3821_p10), %s2113_s22, 2048, %s2095_s9, %s4602_s18, %s3538_s26, [#allocation20], %s3539_s7, 0  }
 0x2f6 PF: > { %s4875_s30 = sld [smem:[#allocation28_spill]]  ;;  %s4876_s16 = sld [smem:[#allocation34_spill]] }
 0x2f7   : > { %p3052_p7 = scmp.ge.s32.totalorder %s3504_s11, 2 }
 0x2fc   : > { %s2140_s12 = sand.u32 1, %s4875_s30   ;;  %p4877_p1 = scmp.ne.s32.totalorder %s4876_s16, 0 }
 0x2fd   : > { %s2141_s24 = scalar_lea.sflag [#allocation4], %s2140_s12 }
 0x2fe   : > { %p3038_p4 = pnand %p3052_p7, %p4877_p1 }
 0x300   : > { %3455 = dma.done.wait (!%p3038_p4), %s2141_s24, 2048  }
 0x301   : > { %3457 = vsyncadd (!%p3038_p4), %s2141_s24, 4294965248  ;;  %s4878_s27 = sadd.s32 4294967294, %s3504_s11  }
 0x302   : > { %s2149_s13 = sand.u32 1, %s4878_s27  }
 0x303   : > { %s2150_s8 = scalar_lea.sflag [#allocation13], %s2149_s13 }
 0x304   : > { %3459 = dma.done.wait (!%p3038_p4), %s2150_s8, 4096  }
 0x305   : > { %3461 = vsyncadd (!%p3038_p4), %s2150_s8, 4294963200  ;;  %s31_s11 = sadd.s32 1, %s3504_s11   ;;  %s4879_s24 = sld [smem:[#allocation26_spill]] }
 0x306   : > { %p28_p10 = scmp.ge.s32.totalorder %s31_s11, 8   ;;  %s4880_s25 = sld [smem:[#allocation27_spill]] }
 0x307   : > { %s4881_s26 = sld [smem:[#allocation37_spill]]  ;;  %s4882_s30 = sld [smem:[#allocation31_spill]] }
 0x308   : > { %s4883_s9 = sld [smem:[#allocation36_spill]]  ;;  %s4884_s27 = smov %s3480_s28 }
 0x309   : > { %s4885_s28 = smov %s3484_s29  ;;  %s4886_s29 = smov %s3835_s14 }
 0x30a   : > { %s4887_s8 = smov %s3500_s10  ;;  %s4888_s10 = smov %s4894_s21 }
 0x30b   :  { %30 = sbr.rel (!%p28_p10) target bundleno = 21 (0x15), region = 167 }
 0x312   :  { %2164 = vsyncpa [#allocation3], 1 }
 0x313   :  { %2166 = vsyncpa [#allocation3 + $0x1], 1 }
 0x314   :  { %2167 = vsyncpa [#allocation6], 1 }
 0x315   :  { %2168 = vsyncpa [#allocation9], 1 }
 0x316   :  { %2170 = vsyncpa [#allocation9 + $0x1], 1 }
 0x317   :  { %2171 = vsyncpa [#allocation4], 1 }
 0x318   :  { %2173 = vsyncpa [#allocation4 + $0x1], 1 }
 0x319   :  { %2174 = vsyncpa [#allocation13], 1 }
 0x31a   :  { %2176 = vsyncpa [#allocation13 + $0x1], 1 }

</bundles_post_ra>
